<compile_context>
chip_gen: v7x
topology: tpu7x:2x2x1
jax: 0.10.0
libtpu: 0.0.40
codegen_flags: <defaults>
</compile_context>

<pallas_src>
import jax
import jax.numpy as jnp
import numpy as np
from jax.experimental import pallas as pl
from jax.experimental.pallas import tpu as pltpu  # noqa: F401  (TPU backend)

EMBED = 100                       # MultiheadAttention embed_dim / W_gnn size
NUM_HEADS = 4
HEAD_DIM = EMBED // NUM_HEADS     # 25
ATTN_SCALE = 1.0 / float(np.sqrt(HEAD_DIM))
BN_EPS = 1e-5


# --------------------------------------------------------------------------- #
# Kernel
# --------------------------------------------------------------------------- #
def _gnn_block(x3, wq_ref, bq_ref, wk_ref, bk_ref, wg_ref, bg_ref):
    """GNN (indicator == 1) forward for the full batch.

    x3: (B, C, T) activation value.
    wq/wk: (T, T) full-width Q/K projections (transposed in_proj rows).
    bq/bk: (1, T).  wg: (T, T) W_gnn.  bg: (1, T) B_gnn.   (VMEM refs)
    """
    b, c, t = x3.shape
    xf = x3.reshape(b * c, t)                        # fold batch into matmul M dim

    # Full-width projections: one (B*C, T) @ (T, T) MXU matmul each.
    q = jnp.dot(xf, wq_ref[...], preferred_element_type=jnp.float32) + bq_ref[...]
    k = jnp.dot(xf, wk_ref[...], preferred_element_type=jnp.float32) + bk_ref[...]
    q3 = q.reshape(b, c, t)
    k3 = k.reshape(b, c, t)

    # All heads at once: stacked lane-masked Q (masked product zeroes non-head
    # lanes, so a full-width contraction equals the per-head 25-dim one).
    lane = jax.lax.broadcasted_iota(jnp.int32, (1, NUM_HEADS, 1, t), 3)
    head = jax.lax.broadcasted_iota(jnp.int32, (1, NUM_HEADS, 1, t), 1)
    mask = jnp.logical_and(lane >= head * HEAD_DIM, lane < (head + 1) * HEAD_DIM)
    q_stacked = jnp.where(mask, q3[:, None, :, :], 0.0)          # (B, H, C, T)
    q_stacked = q_stacked.reshape(b, NUM_HEADS * c, t)           # (B, H*C, T)

    # One batched score matmul for all heads (K transpose emitted once / batch).
    s = jnp.einsum('bqd,bkd->bqk', q_stacked, k3,
                   preferred_element_type=jnp.float32) * ATTN_SCALE   # (B, H*C, C)
    s = s - jnp.max(s, axis=-1, keepdims=True)
    e = jnp.exp(s)
    p = e * pl.reciprocal(jnp.sum(e, axis=-1, keepdims=True), approx=True)
    attn = jnp.mean(p.reshape(b, NUM_HEADS, c, c), axis=1)       # head-averaged `b`

    y = jnp.einsum('bqk,bkt->bqt', attn, x3,
                   preferred_element_type=jnp.float32)           # bmm(b, x)
    yf = y.reshape(b * c, t)
    yf = jnp.dot(yf, wg_ref[...], preferred_element_type=jnp.float32) + bg_ref[...]
    return yf.reshape(b, c, t)


def spatial_layer_kernel(x_ref,
                         wq1, bq1, wk1, bk1, wg1, bg1,
                         wq2, bq2, wk2, bk2, wg2, bg2,
                         gamma_ref, beta_ref,
                         out_ref):
    """Fused: GNN1 -> relu -> GNN2 -> BatchNorm1d(train) -> relu -> +x."""
    x = x_ref[...]                                   # (B, C, T)
    b, c, t = x.shape

    # batch1(x2) output is discarded in the torch source -> omitted.
    y1 = jnp.maximum(_gnn_block(x, wq1, bq1, wk1, bk1, wg1, bg1), 0.0)
    y2 = _gnn_block(y1, wq2, bq2, wk2, bk2, wg2, bg2)

    # Training-mode BatchNorm1d(C): per-channel stats over (B, T), biased var.
    # Single pass: independent sum / sum-of-squares reductions, then one fused
    # per-channel scale/shift (2 full-size VPU ops instead of 4).
    inv_n = 1.0 / float(b * t)
    s1 = jnp.sum(jnp.sum(y2, axis=2, keepdims=True), axis=0, keepdims=True)
    s2 = jnp.sum(jnp.sum(y2 * y2, axis=2, keepdims=True), axis=0, keepdims=True)
    mean = s1 * inv_n                                 # (1, C, 1)
    var = jnp.maximum(s2 * inv_n - mean * mean, 0.0)  # clamp tiny negative drift
    scale = jax.lax.rsqrt(var + BN_EPS) * gamma_ref[...]
    shift = beta_ref[...] - mean * scale
    out_ref[...] = x + jnp.maximum(y2 * scale + shift, 0.0)


# --------------------------------------------------------------------------- #
# Wrapper
# --------------------------------------------------------------------------- #
def spatial_layer_forward(x, params):
    B, C, T = x.shape
    assert T == EMBED

    args = []
    for g in ("gnn1", "gnn2"):
        p = params[g]
        args += [p["wq_t"], p["bq"], p["wk_t"], p["bk"], p["w_gnn"], p["b_gnn"]]
    gamma = params["bn2_gamma"].reshape(1, C, 1)
    beta = params["bn2_beta"].reshape(1, C, 1)

    # Single fused kernel, no grid: whole batch + all weights resident in VMEM
    # (<~0.3 MiB total), output written once.  If this layer were called in an
    # outer loop / larger batch, that loop should become a grid axis with
    # constant index_maps on the weights to amortize dispatch overhead.
    return pl.pallas_call(
        spatial_layer_kernel,
        out_shape=jax.ShapeDtypeStruct((B, C, T), jnp.float32),
    )(x, *args, gamma, beta)


# --------------------------------------------------------------------------- #
# Deterministic parameter init (shapes from the module __init__)
# --------------------------------------------------------------------------- #
def xavier_uniform(key, shape):
    fan_in, fan_out = shape[0], shape[1]
    limit = float(np.sqrt(6.0 / (fan_in + fan_out)))
    return jax.random.uniform(key, shape, jnp.float32, -limit, limit)


def init_gnn_params(key):
    k1, k2, k3, k4 = jax.random.split(key, 4)
    in_proj_w = xavier_uniform(k1, (3 * EMBED, EMBED))                 # MHA in_proj_weight
    in_proj_b = 0.02 * jax.random.normal(k2, (3 * EMBED,), jnp.float32)
    w_gnn = xavier_uniform(k3, (EMBED, EMBED))                         # W_gnn (100,100)
    b_gnn = jax.random.normal(k4, (EMBED,), jnp.float32)               # B_gnn (100,)

    return {
        "wq_t": in_proj_w[:EMBED].T,                       # (T, T)
        "wk_t": in_proj_w[EMBED:2 * EMBED].T,              # (T, T)
        "bq": in_proj_b[:EMBED].reshape(1, EMBED),
        "bk": in_proj_b[EMBED:2 * EMBED].reshape(1, EMBED),
        "w_gnn": w_gnn,
        "b_gnn": b_gnn.reshape(1, EMBED),
    }


# --------------------------------------------------------------------------- #
# Pure-JAX reference (for correctness check)
# --------------------------------------------------------------------------- #
def ref_gnn(x, p):
    q = jnp.einsum('bct,td->bcd', x, p["wq_t"]) + p["bq"]
    k = jnp.einsum('bct,td->bcd', x, p["wk_t"]) + p["bk"]
    B, C, T = x.shape
    qh = q.reshape(B, C, NUM_HEADS, HEAD_DIM)
    kh = k.reshape(B, C, NUM_HEADS, HEAD_DIM)
    s = jnp.einsum('bqhd,bkhd->bhqk', qh, kh) * ATTN_SCALE
    attn = jnp.mean(jax.nn.softmax(s, axis=-1), axis=1)       # head-averaged weights
    y = jnp.einsum('bqk,bkt->bqt', attn, x)
    y = jnp.einsum('bct,tu->bcu', y, p["w_gnn"]) + p["b_gnn"]
    return y


def ref_forward(x, params):
    y1 = jax.nn.relu(ref_gnn(x, params["gnn1"]))              # batch1 output discarded
    y2 = ref_gnn(y1, params["gnn2"])
    mean = jnp.mean(y2, axis=(0, 2), keepdims=True)
    var = jnp.mean((y2 - mean) ** 2, axis=(0, 2), keepdims=True)
    y2 = (y2 - mean) * jax.lax.rsqrt(var + BN_EPS)
    y2 = y2 * params["bn2_gamma"][None, :, None] + params["bn2_beta"][None, :, None]
    return x + jax.nn.relu(y2)


# --------------------------------------------------------------------------- #
if __name__ == "__main__":
    # Spatial_layer(in_dim=8, out_dim=8, indicator=1); x: (B, in_dim, 100)
    B, IN_DIM = 2, 8
    key = jax.random.PRNGKey(0)
    kx, kg1, kg2 = jax.random.split(key, 3)
    x = jax.random.normal(kx, (B, IN_DIM, EMBED), jnp.float32)

    params = {
        "gnn1": init_gnn_params(kg1),
        "gnn2": init_gnn_params(kg2),
        "bn2_gamma": jnp.ones((IN_DIM,), jnp.float32),   # BatchNorm1d default init
        "bn2_beta": jnp.zeros((IN_DIM,), jnp.float32),
    }

    fwd = jax.jit(spatial_layer_forward)
    out = jax.block_until_ready(fwd(x, params))
    ref = jax.block_until_ready(ref_forward(x, params))
    np.testing.assert_allclose(np.asarray(out), np.asarray(ref), atol=2e-3, rtol=2e-3)

    # TODO(synk): GNN.attention_storage (per-label Python-dict accumulation of
    # attention maps) and batch1's running-stat update are host/stateful side
    # effects with no Pallas equivalent; they do not affect the forward output.
    print("KERNEL_OK")
</pallas_src>

<mosaic_0001>
module attributes {stable_mosaic.version = 11 : i64} {
  func.func @spatial_layer_kernel(%arg0: memref<2x8x100xf32, #tpu.memory_space<vmem>>, %arg1: memref<100x100xf32, #tpu.memory_space<vmem>>, %arg2: memref<1x100xf32, #tpu.memory_space<vmem>>, %arg3: memref<100x100xf32, #tpu.memory_space<vmem>>, %arg4: memref<1x100xf32, #tpu.memory_space<vmem>>, %arg5: memref<100x100xf32, #tpu.memory_space<vmem>>, %arg6: memref<1x100xf32, #tpu.memory_space<vmem>>, %arg7: memref<100x100xf32, #tpu.memory_space<vmem>>, %arg8: memref<1x100xf32, #tpu.memory_space<vmem>>, %arg9: memref<100x100xf32, #tpu.memory_space<vmem>>, %arg10: memref<1x100xf32, #tpu.memory_space<vmem>>, %arg11: memref<100x100xf32, #tpu.memory_space<vmem>>, %arg12: memref<1x100xf32, #tpu.memory_space<vmem>>, %arg13: memref<1x8x1xf32, #tpu.memory_space<vmem>>, %arg14: memref<1x8x1xf32, #tpu.memory_space<vmem>>, %arg15: memref<2x8x100xf32, #tpu.memory_space<vmem>>) attributes {dimension_semantics = [], scalar_prefetch = 0 : i64, scratch_operands = 0 : i64, tpu.core_type = #tpu.core_type<tc>} {
    %c0 = arith.constant 0 : index
    %c0_0 = arith.constant 0 : index
    %c0_1 = arith.constant 0 : index
    %0 = vector.load %arg0[%c0, %c0_0, %c0_1] : memref<2x8x100xf32, #tpu.memory_space<vmem>>, vector<2x8x100xf32>
    %1 = vector.shape_cast %0 : vector<2x8x100xf32> to vector<16x100xf32>
    %c0_2 = arith.constant 0 : index
    %c0_3 = arith.constant 0 : index
    %2 = vector.load %arg1[%c0_2, %c0_3] : memref<100x100xf32, #tpu.memory_space<vmem>>, vector<100x100xf32>
    %cst = arith.constant dense<0.000000e+00> : vector<16x100xf32>
    %3 = tpu.matmul %1, %2, %cst {dimension_numbers = #tpu.dot_dimension_numbers<[1], [0], [0], [1], [0, 0, 1, 1], [], []>} : vector<16x100xf32>, vector<100x100xf32>, vector<16x100xf32> -> vector<16x100xf32>
    %c0_4 = arith.constant 0 : index
    %c0_5 = arith.constant 0 : index
    %4 = vector.load %arg2[%c0_4, %c0_5] : memref<1x100xf32, #tpu.memory_space<vmem>>, vector<1x100xf32>
    %5 = vector.broadcast %4 : vector<1x100xf32> to vector<16x100xf32>
    %6 = arith.addf %3, %5 : vector<16x100xf32>
    %c0_6 = arith.constant 0 : index
    %c0_7 = arith.constant 0 : index
    %7 = vector.load %arg3[%c0_6, %c0_7] : memref<100x100xf32, #tpu.memory_space<vmem>>, vector<100x100xf32>
    %cst_8 = arith.constant dense<0.000000e+00> : vector<16x100xf32>
    %8 = tpu.matmul %1, %7, %cst_8 {dimension_numbers = #tpu.dot_dimension_numbers<[1], [0], [0], [1], [0, 0, 1, 1], [], []>} : vector<16x100xf32>, vector<100x100xf32>, vector<16x100xf32> -> vector<16x100xf32>
    %c0_9 = arith.constant 0 : index
    %c0_10 = arith.constant 0 : index
    %9 = vector.load %arg4[%c0_9, %c0_10] : memref<1x100xf32, #tpu.memory_space<vmem>>, vector<1x100xf32>
    %10 = vector.broadcast %9 : vector<1x100xf32> to vector<16x100xf32>
    %11 = arith.addf %8, %10 : vector<16x100xf32>
    %12 = vector.shape_cast %6 : vector<16x100xf32> to vector<2x8x100xf32>
    %13 = vector.shape_cast %11 : vector<16x100xf32> to vector<2x8x100xf32>
    %14 = tpu.iota {dimensions = array<i32: 3>} : vector<1x4x1x100xi32>
    %15 = tpu.iota {dimensions = array<i32: 1>} : vector<1x4x1x100xi32>
    %c25_i32 = arith.constant 25 : i32
    %16 = vector.broadcast %c25_i32 : i32 to vector<1x4x1x100xi32>
    %17 = arith.muli %15, %16 : vector<1x4x1x100xi32>
    %18 = arith.cmpi sge, %14, %17 : vector<1x4x1x100xi32>
    %c1_i32 = arith.constant 1 : i32
    %19 = vector.broadcast %c1_i32 : i32 to vector<1x4x1x100xi32>
    %20 = arith.addi %15, %19 : vector<1x4x1x100xi32>
    %c25_i32_11 = arith.constant 25 : i32
    %21 = vector.broadcast %c25_i32_11 : i32 to vector<1x4x1x100xi32>
    %22 = arith.muli %20, %21 : vector<1x4x1x100xi32>
    %23 = arith.cmpi slt, %14, %22 : vector<1x4x1x100xi32>
    %24 = arith.andi %18, %23 : vector<1x4x1x100xi1>
    %25 = vector.shape_cast %12 : vector<2x8x100xf32> to vector<2x1x8x100xf32>
    %cst_12 = arith.constant 0.000000e+00 : f32
    %26 = vector.shape_cast %24 : vector<1x4x1x100xi1> to vector<1x4x1x100xi1>
    %27 = vector.broadcast %26 : vector<1x4x1x100xi1> to vector<2x4x8x100xi1>
    %28 = vector.shape_cast %25 : vector<2x1x8x100xf32> to vector<2x1x8x100xf32>
    %29 = vector.broadcast %28 : vector<2x1x8x100xf32> to vector<2x4x8x100xf32>
    %30 = vector.broadcast %cst_12 : f32 to vector<2x4x8x100xf32>
    %31 = arith.select %27, %29, %30 : vector<2x4x8x100xi1>, vector<2x4x8x100xf32>
    %32 = vector.shape_cast %31 : vector<2x4x8x100xf32> to vector<2x32x100xf32>
    "tpu.trace_start"() <{level = 10 : i32, message = "bqd,bkd->bqk"}> : () -> ()
    %cst_13 = arith.constant dense<0.000000e+00> : vector<2x32x8xf32>
    %33 = tpu.matmul %32, %13, %cst_13 {dimension_numbers = #tpu.dot_dimension_numbers<[2], [2], [1], [1], [0, 0, 0, 1, 1, 1], [0], [0]>} : vector<2x32x100xf32>, vector<2x8x100xf32>, vector<2x32x8xf32> -> vector<2x32x8xf32>
    "tpu.trace_stop"() : () -> ()
    %cst_14 = arith.constant 2.000000e-01 : f32
    %34 = vector.broadcast %cst_14 : f32 to vector<2x32x8xf32>
    %35 = arith.mulf %33, %34 : vector<2x32x8xf32>
    %cst_15 = arith.constant dense<0xFF800000> : vector<2x32xf32>
    %36 = vector.multi_reduction <maximumf>, %35, %cst_15 [2] : vector<2x32x8xf32> to vector<2x32xf32>
    %37 = vector.shape_cast %36 : vector<2x32xf32> to vector<2x32x1xf32>
    %38 = vector.broadcast %37 : vector<2x32x1xf32> to vector<2x32x8xf32>
    %39 = arith.subf %35, %38 : vector<2x32x8xf32>
    %40 = math.exp %39 : vector<2x32x8xf32>
    %cst_16 = arith.constant dense<0.000000e+00> : vector<2x32xf32>
    %41 = vector.multi_reduction <add>, %40, %cst_16 [2] : vector<2x32x8xf32> to vector<2x32xf32>
    %42 = vector.shape_cast %41 : vector<2x32xf32> to vector<2x32x1xf32>
    %43 = tpu.reciprocal %42 {approx = true} : vector<2x32x1xf32> -> vector<2x32x1xf32>
    %44 = vector.broadcast %43 : vector<2x32x1xf32> to vector<2x32x8xf32>
    %45 = arith.mulf %40, %44 : vector<2x32x8xf32>
    %46 = vector.shape_cast %45 : vector<2x32x8xf32> to vector<2x4x8x8xf32>
    %cst_17 = arith.constant dense<0.000000e+00> : vector<2x8x8xf32>
    %47 = vector.multi_reduction <add>, %46, %cst_17 [1] : vector<2x4x8x8xf32> to vector<2x8x8xf32>
    %cst_18 = arith.constant 4.000000e+00 : f32
    %48 = vector.broadcast %cst_18 : f32 to vector<2x8x8xf32>
    %49 = arith.divf %47, %48 : vector<2x8x8xf32>
    "tpu.trace_start"() <{level = 10 : i32, message = "bqk,bkt->bqt"}> : () -> ()
    %cst_19 = arith.constant dense<0.000000e+00> : vector<2x8x100xf32>
    %50 = tpu.matmul %49, %0, %cst_19 {dimension_numbers = #tpu.dot_dimension_numbers<[2], [1], [1], [2], [0, 0, 0, 1, 1, 2], [0], [0]>} : vector<2x8x8xf32>, vector<2x8x100xf32>, vector<2x8x100xf32> -> vector<2x8x100xf32>
    "tpu.trace_stop"() : () -> ()
    %51 = vector.shape_cast %50 : vector<2x8x100xf32> to vector<16x100xf32>
    %c0_20 = arith.constant 0 : index
    %c0_21 = arith.constant 0 : index
    %52 = vector.load %arg5[%c0_20, %c0_21] : memref<100x100xf32, #tpu.memory_space<vmem>>, vector<100x100xf32>
    %cst_22 = arith.constant dense<0.000000e+00> : vector<16x100xf32>
    %53 = tpu.matmul %51, %52, %cst_22 {dimension_numbers = #tpu.dot_dimension_numbers<[1], [0], [0], [1], [0, 0, 1, 1], [], []>} : vector<16x100xf32>, vector<100x100xf32>, vector<16x100xf32> -> vector<16x100xf32>
    %c0_23 = arith.constant 0 : index
    %c0_24 = arith.constant 0 : index
    %54 = vector.load %arg6[%c0_23, %c0_24] : memref<1x100xf32, #tpu.memory_space<vmem>>, vector<1x100xf32>
    %55 = vector.broadcast %54 : vector<1x100xf32> to vector<16x100xf32>
    %56 = arith.addf %53, %55 : vector<16x100xf32>
    %57 = vector.shape_cast %56 : vector<16x100xf32> to vector<2x8x100xf32>
    %cst_25 = arith.constant 0.000000e+00 : f32
    %58 = vector.broadcast %cst_25 : f32 to vector<2x8x100xf32>
    %59 = arith.maximumf %57, %58 : vector<2x8x100xf32>
    %60 = vector.shape_cast %59 : vector<2x8x100xf32> to vector<16x100xf32>
    %c0_26 = arith.constant 0 : index
    %c0_27 = arith.constant 0 : index
    %61 = vector.load %arg7[%c0_26, %c0_27] : memref<100x100xf32, #tpu.memory_space<vmem>>, vector<100x100xf32>
    %cst_28 = arith.constant dense<0.000000e+00> : vector<16x100xf32>
    %62 = tpu.matmul %60, %61, %cst_28 {dimension_numbers = #tpu.dot_dimension_numbers<[1], [0], [0], [1], [0, 0, 1, 1], [], []>} : vector<16x100xf32>, vector<100x100xf32>, vector<16x100xf32> -> vector<16x100xf32>
    %c0_29 = arith.constant 0 : index
    %c0_30 = arith.constant 0 : index
    %63 = vector.load %arg8[%c0_29, %c0_30] : memref<1x100xf32, #tpu.memory_space<vmem>>, vector<1x100xf32>
    %64 = vector.broadcast %63 : vector<1x100xf32> to vector<16x100xf32>
    %65 = arith.addf %62, %64 : vector<16x100xf32>
    %c0_31 = arith.constant 0 : index
    %c0_32 = arith.constant 0 : index
    %66 = vector.load %arg9[%c0_31, %c0_32] : memref<100x100xf32, #tpu.memory_space<vmem>>, vector<100x100xf32>
    %cst_33 = arith.constant dense<0.000000e+00> : vector<16x100xf32>
    %67 = tpu.matmul %60, %66, %cst_33 {dimension_numbers = #tpu.dot_dimension_numbers<[1], [0], [0], [1], [0, 0, 1, 1], [], []>} : vector<16x100xf32>, vector<100x100xf32>, vector<16x100xf32> -> vector<16x100xf32>
    %c0_34 = arith.constant 0 : index
    %c0_35 = arith.constant 0 : index
    %68 = vector.load %arg10[%c0_34, %c0_35] : memref<1x100xf32, #tpu.memory_space<vmem>>, vector<1x100xf32>
    %69 = vector.broadcast %68 : vector<1x100xf32> to vector<16x100xf32>
    %70 = arith.addf %67, %69 : vector<16x100xf32>
    %71 = vector.shape_cast %65 : vector<16x100xf32> to vector<2x8x100xf32>
    %72 = vector.shape_cast %70 : vector<16x100xf32> to vector<2x8x100xf32>
    %73 = tpu.iota {dimensions = array<i32: 3>} : vector<1x4x1x100xi32>
    %74 = tpu.iota {dimensions = array<i32: 1>} : vector<1x4x1x100xi32>
    %c25_i32_36 = arith.constant 25 : i32
    %75 = vector.broadcast %c25_i32_36 : i32 to vector<1x4x1x100xi32>
    %76 = arith.muli %74, %75 : vector<1x4x1x100xi32>
    %77 = arith.cmpi sge, %73, %76 : vector<1x4x1x100xi32>
    %c1_i32_37 = arith.constant 1 : i32
    %78 = vector.broadcast %c1_i32_37 : i32 to vector<1x4x1x100xi32>
    %79 = arith.addi %74, %78 : vector<1x4x1x100xi32>
    %c25_i32_38 = arith.constant 25 : i32
    %80 = vector.broadcast %c25_i32_38 : i32 to vector<1x4x1x100xi32>
    %81 = arith.muli %79, %80 : vector<1x4x1x100xi32>
    %82 = arith.cmpi slt, %73, %81 : vector<1x4x1x100xi32>
    %83 = arith.andi %77, %82 : vector<1x4x1x100xi1>
    %84 = vector.shape_cast %71 : vector<2x8x100xf32> to vector<2x1x8x100xf32>
    %cst_39 = arith.constant 0.000000e+00 : f32
    %85 = vector.shape_cast %83 : vector<1x4x1x100xi1> to vector<1x4x1x100xi1>
    %86 = vector.broadcast %85 : vector<1x4x1x100xi1> to vector<2x4x8x100xi1>
    %87 = vector.shape_cast %84 : vector<2x1x8x100xf32> to vector<2x1x8x100xf32>
    %88 = vector.broadcast %87 : vector<2x1x8x100xf32> to vector<2x4x8x100xf32>
    %89 = vector.broadcast %cst_39 : f32 to vector<2x4x8x100xf32>
    %90 = arith.select %86, %88, %89 : vector<2x4x8x100xi1>, vector<2x4x8x100xf32>
    %91 = vector.shape_cast %90 : vector<2x4x8x100xf32> to vector<2x32x100xf32>
    "tpu.trace_start"() <{level = 10 : i32, message = "bqd,bkd->bqk"}> : () -> ()
    %cst_40 = arith.constant dense<0.000000e+00> : vector<2x32x8xf32>
    %92 = tpu.matmul %91, %72, %cst_40 {dimension_numbers = #tpu.dot_dimension_numbers<[2], [2], [1], [1], [0, 0, 0, 1, 1, 1], [0], [0]>} : vector<2x32x100xf32>, vector<2x8x100xf32>, vector<2x32x8xf32> -> vector<2x32x8xf32>
    "tpu.trace_stop"() : () -> ()
    %cst_41 = arith.constant 2.000000e-01 : f32
    %93 = vector.broadcast %cst_41 : f32 to vector<2x32x8xf32>
    %94 = arith.mulf %92, %93 : vector<2x32x8xf32>
    %cst_42 = arith.constant dense<0xFF800000> : vector<2x32xf32>
    %95 = vector.multi_reduction <maximumf>, %94, %cst_42 [2] : vector<2x32x8xf32> to vector<2x32xf32>
    %96 = vector.shape_cast %95 : vector<2x32xf32> to vector<2x32x1xf32>
    %97 = vector.broadcast %96 : vector<2x32x1xf32> to vector<2x32x8xf32>
    %98 = arith.subf %94, %97 : vector<2x32x8xf32>
    %99 = math.exp %98 : vector<2x32x8xf32>
    %cst_43 = arith.constant dense<0.000000e+00> : vector<2x32xf32>
    %100 = vector.multi_reduction <add>, %99, %cst_43 [2] : vector<2x32x8xf32> to vector<2x32xf32>
    %101 = vector.shape_cast %100 : vector<2x32xf32> to vector<2x32x1xf32>
    %102 = tpu.reciprocal %101 {approx = true} : vector<2x32x1xf32> -> vector<2x32x1xf32>
    %103 = vector.broadcast %102 : vector<2x32x1xf32> to vector<2x32x8xf32>
    %104 = arith.mulf %99, %103 : vector<2x32x8xf32>
    %105 = vector.shape_cast %104 : vector<2x32x8xf32> to vector<2x4x8x8xf32>
    %cst_44 = arith.constant dense<0.000000e+00> : vector<2x8x8xf32>
    %106 = vector.multi_reduction <add>, %105, %cst_44 [1] : vector<2x4x8x8xf32> to vector<2x8x8xf32>
    %cst_45 = arith.constant 4.000000e+00 : f32
    %107 = vector.broadcast %cst_45 : f32 to vector<2x8x8xf32>
    %108 = arith.divf %106, %107 : vector<2x8x8xf32>
    "tpu.trace_start"() <{level = 10 : i32, message = "bqk,bkt->bqt"}> : () -> ()
    %cst_46 = arith.constant dense<0.000000e+00> : vector<2x8x100xf32>
    %109 = tpu.matmul %108, %59, %cst_46 {dimension_numbers = #tpu.dot_dimension_numbers<[2], [1], [1], [2], [0, 0, 0, 1, 1, 2], [0], [0]>} : vector<2x8x8xf32>, vector<2x8x100xf32>, vector<2x8x100xf32> -> vector<2x8x100xf32>
    "tpu.trace_stop"() : () -> ()
    %110 = vector.shape_cast %109 : vector<2x8x100xf32> to vector<16x100xf32>
    %c0_47 = arith.constant 0 : index
    %c0_48 = arith.constant 0 : index
    %111 = vector.load %arg11[%c0_47, %c0_48] : memref<100x100xf32, #tpu.memory_space<vmem>>, vector<100x100xf32>
    %cst_49 = arith.constant dense<0.000000e+00> : vector<16x100xf32>
    %112 = tpu.matmul %110, %111, %cst_49 {dimension_numbers = #tpu.dot_dimension_numbers<[1], [0], [0], [1], [0, 0, 1, 1], [], []>} : vector<16x100xf32>, vector<100x100xf32>, vector<16x100xf32> -> vector<16x100xf32>
    %c0_50 = arith.constant 0 : index
    %c0_51 = arith.constant 0 : index
    %113 = vector.load %arg12[%c0_50, %c0_51] : memref<1x100xf32, #tpu.memory_space<vmem>>, vector<1x100xf32>
    %114 = vector.broadcast %113 : vector<1x100xf32> to vector<16x100xf32>
    %115 = arith.addf %112, %114 : vector<16x100xf32>
    %116 = vector.shape_cast %115 : vector<16x100xf32> to vector<2x8x100xf32>
    %cst_52 = arith.constant dense<0.000000e+00> : vector<2x8xf32>
    %117 = vector.multi_reduction <add>, %116, %cst_52 [2] : vector<2x8x100xf32> to vector<2x8xf32>
    %118 = vector.shape_cast %117 : vector<2x8xf32> to vector<2x8x1xf32>
    %cst_53 = arith.constant dense<0.000000e+00> : vector<8x1xf32>
    %119 = vector.multi_reduction <add>, %118, %cst_53 [0] : vector<2x8x1xf32> to vector<8x1xf32>
    %120 = vector.shape_cast %119 : vector<8x1xf32> to vector<1x8x1xf32>
    %121 = arith.mulf %116, %116 : vector<2x8x100xf32>
    %cst_54 = arith.constant dense<0.000000e+00> : vector<2x8xf32>
    %122 = vector.multi_reduction <add>, %121, %cst_54 [2] : vector<2x8x100xf32> to vector<2x8xf32>
    %123 = vector.shape_cast %122 : vector<2x8xf32> to vector<2x8x1xf32>
    %cst_55 = arith.constant dense<0.000000e+00> : vector<8x1xf32>
    %124 = vector.multi_reduction <add>, %123, %cst_55 [0] : vector<2x8x1xf32> to vector<8x1xf32>
    %125 = vector.shape_cast %124 : vector<8x1xf32> to vector<1x8x1xf32>
    %cst_56 = arith.constant 5.000000e-03 : f32
    %126 = vector.broadcast %cst_56 : f32 to vector<1x8x1xf32>
    %127 = arith.mulf %120, %126 : vector<1x8x1xf32>
    %cst_57 = arith.constant 5.000000e-03 : f32
    %128 = vector.broadcast %cst_57 : f32 to vector<1x8x1xf32>
    %129 = arith.mulf %125, %128 : vector<1x8x1xf32>
    %130 = arith.mulf %127, %127 : vector<1x8x1xf32>
    %131 = arith.subf %129, %130 : vector<1x8x1xf32>
    %cst_58 = arith.constant 0.000000e+00 : f32
    %132 = vector.broadcast %cst_58 : f32 to vector<1x8x1xf32>
    %133 = arith.maximumf %131, %132 : vector<1x8x1xf32>
    %cst_59 = arith.constant 9.99999974E-6 : f32
    %134 = vector.broadcast %cst_59 : f32 to vector<1x8x1xf32>
    %135 = arith.addf %133, %134 : vector<1x8x1xf32>
    %136 = math.rsqrt %135 : vector<1x8x1xf32>
    %c0_60 = arith.constant 0 : index
    %c0_61 = arith.constant 0 : index
    %c0_62 = arith.constant 0 : index
    %137 = vector.load %arg13[%c0_60, %c0_61, %c0_62] : memref<1x8x1xf32, #tpu.memory_space<vmem>>, vector<1x8x1xf32>
    %138 = arith.mulf %136, %137 : vector<1x8x1xf32>
    %c0_63 = arith.constant 0 : index
    %c0_64 = arith.constant 0 : index
    %c0_65 = arith.constant 0 : index
    %139 = vector.load %arg14[%c0_63, %c0_64, %c0_65] : memref<1x8x1xf32, #tpu.memory_space<vmem>>, vector<1x8x1xf32>
    %140 = arith.mulf %127, %138 : vector<1x8x1xf32>
    %141 = arith.subf %139, %140 : vector<1x8x1xf32>
    %142 = vector.broadcast %138 : vector<1x8x1xf32> to vector<2x8x100xf32>
    %143 = arith.mulf %116, %142 : vector<2x8x100xf32>
    %144 = vector.broadcast %141 : vector<1x8x1xf32> to vector<2x8x100xf32>
    %145 = arith.addf %143, %144 : vector<2x8x100xf32>
    %cst_66 = arith.constant 0.000000e+00 : f32
    %146 = vector.broadcast %cst_66 : f32 to vector<2x8x100xf32>
    %147 = arith.maximumf %145, %146 : vector<2x8x100xf32>
    %148 = arith.addf %0, %147 : vector<2x8x100xf32>
    %c0_67 = arith.constant 0 : index
    %c0_68 = arith.constant 0 : index
    %c0_69 = arith.constant 0 : index
    %149 = vector.load %arg15[%c0_67, %c0_68, %c0_69] : memref<2x8x100xf32, #tpu.memory_space<vmem>>, vector<2x8x100xf32>
    tpu.vector_store %arg15[%c0_67, %c0_68, %c0_69], %148 {strides = array<i32>} : memref<2x8x100xf32, #tpu.memory_space<vmem>>, vector<2x8x100xf32>,
    return
  }
}

</mosaic_0001>

<bundles_post_ra>
// kernel: spatial_layer_forward.1
= control target key start
LH: loop header
LB: loop body
LE: loop exit
PB: predicated region body
PF: predicated region fallthrough
CT: control target
= control target key end

     0   :  { %20 = vsyncpa [#allocation3], 0  ;;  %s2997_s0 = inlined_call_operand.vmem [shape: f32[2,8,100], index: 0, kind: input, shape index: {}]   ;;  %s2998_s1 = inlined_call_operand.hbm [shape: f32[100,100], index: 1, kind: input, shape index: {}]   ;;  %s2999_s2 = inlined_call_operand.vmem [shape: f32[1,100], index: 2, kind: input, shape index: {}]   ;;  %s3000_s3 = inlined_call_operand.hbm [shape: f32[100,100], index: 3, kind: input, shape index: {}]   ;;  %s3001_s4 = inlined_call_operand.vmem [shape: f32[1,100], index: 4, kind: input, shape index: {}]   ;;  %s3002_s5 = inlined_call_operand.hbm [shape: f32[100,100], index: 5, kind: input, shape index: {}]   ;;  %s3003_s6 = inlined_call_operand.vmem [shape: f32[1,100], index: 6, kind: input, shape index: {}]   ;;  %s3004_s7 = inlined_call_operand.hbm [shape: f32[100,100], index: 7, kind: input, shape index: {}]   ;;  %s3005_s8 = inlined_call_operand.vmem [shape: f32[1,100], index: 8, kind: input, shape index: {}]   ;;  %s3006_s9 = inlined_call_operand.hbm [shape: f32[100,100], index: 9, kind: input, shape index: {}]   ;;  %s3007_s10 = inlined_call_operand.vmem [shape: f32[1,100], index: 10, kind: input, shape index: {}]   ;;  %s3008_s11 = inlined_call_operand.hbm [shape: f32[100,100], index: 11, kind: input, shape index: {}]   ;;  %s3009_s12 = inlined_call_operand.vmem [shape: f32[1,100], index: 12, kind: input, shape index: {}]   ;;  %s3010_s13 = inlined_call_operand.vmem [shape: f32[1,8,1], index: 13, kind: input, shape index: {}]   ;;  %s3011_s14 = inlined_call_operand.vmem [shape: f32[1,8,1], index: 14, kind: input, shape index: {}]   ;;  %s3012_s15 = inlined_call_operand.hbm [shape: f32[2,8,100], index: 15, kind: output, shape index: {}]  }
   0x1   :  { %21 = vsyncpa [#allocation6], 0 }
   0x2   :  { %22 = vsyncpa [#allocation9], 0 }
   0x3   :  { %23 = vsyncpa [#allocation12], 0 }
   0x4   :  { %24 = vsyncpa [#allocation4], 0  ;;  %s2557_s18 = smov [#allocation5]   ;;  %s2558_s20 = smov [#allocation8]  }
   0x5   :  { %s46_s19 = sshll.u32 %s2557_s18, 4  ;;  %s74_s21 = sshll.u32 %s2558_s20, 4  ;;  %s47_s19 = int_to_ptr.vmem [resolvable:$true] %s46_s19  ;;  %s2649_s21 = int_to_ptr.vmem [resolvable:$true] %s74_s21 }
   0x6   :  { %s2393_s24 = scalar_lea.hbm %s3000_s3, 1664 }
   0x7   :  { %p2394_p0 = scmp.ne.s32.totalorder %s3000_s3, %s2393_s24  ;;  %p2397_p1 = scmp.lt.u32.totalorder %s2393_s24, %s3000_s3 }
   0x9   :  { %p2399_p2 = pnand %p2397_p1, %p2394_p0 }
   0xb   :  { %2402 = shalt.err (!%p2399_p2)
}
   0xc   :  { %s2403_s29 = scalar_lea.vmem %s47_s19, 1664  ;;  %p2408_p4 = scmp.lt.s32.totalorder %s47_s19, %s47_s19 }
   0xd   :  { %p2404_p3 = scmp.ne.s32.totalorder %s47_s19, %s2403_s29  ;;  %p2409_p5 = scmp.lt.s32.totalorder %s2403_s29, %s2403_s29 }
   0xf   :  { %p2410_p6 = por %p2409_p5, %p2408_p4 }
  0x11   :  { %p2411_p7 = pnand %p2410_p6, %p2404_p3 }
  0x13   :  { %2414 = shalt.err (!%p2411_p7)
}
  0x14   :  { %s2559_s30 = smov 128   ;;  %s2560_s16 = smov 8  }
  0x15   :  { %52 = dma.hbm_to_vmem [thread:$0]  %s3000_s3, 1664, %s47_s19, [#allocation6], %s2559_s30, %s2559_s30, %s2560_s16  }
  0x16   :  { %s2415_s23 = scalar_lea.hbm %s3004_s7, 1664 }
  0x17   :  { %p2416_p8 = scmp.ne.s32.totalorder %s3004_s7, %s2415_s23  ;;  %p2419_p9 = scmp.lt.u32.totalorder %s2415_s23, %s3004_s7 }
  0x19   :  { %p2421_p10 = pnand %p2419_p9, %p2416_p8 }
  0x1b   :  { %2424 = shalt.err (!%p2421_p10)
}
  0x1c   :  { %s2425_s28 = scalar_lea.vmem %s2649_s21, 1664  ;;  %p2430_p12 = scmp.lt.s32.totalorder %s2649_s21, %s2649_s21 }
  0x1d   :  { %p2426_p11 = scmp.ne.s32.totalorder %s2649_s21, %s2425_s28  ;;  %p2431_p13 = scmp.lt.s32.totalorder %s2425_s28, %s2425_s28 }
  0x1f   :  { %p2432_p0 = por %p2431_p13, %p2430_p12 }
  0x21   :  { %p2433_p1 = pnand %p2432_p0, %p2426_p11 }
  0x23   :  { %2436 = shalt.err (!%p2433_p1)
}
  0x24   :  { %80 = dma.hbm_to_vmem [thread:$0]  %s3004_s7, 1664, %s2649_s21, [#allocation9], %s2559_s30, %s2559_s30, %s2560_s16  }
  0x25   :  { %s2561_s29 = smov [#allocation2]   ;;  %s2562_s18 = smov [#allocation7]  }
  0x26   :  { %s32_s17 = sshll.u32 %s2561_s29, 4  ;;  %s60_s20 = sshll.u32 %s2562_s18, 4  ;;  %s33_s17 = int_to_ptr.vmem [resolvable:$true] %s32_s17  ;;  %s2686_s20 = int_to_ptr.vmem [resolvable:$true] %s60_s20 }
  0x27   :  { %s2437_s24 = scalar_lea.hbm %s2998_s1, 1664 }
  0x28   :  { %p2438_p2 = scmp.ne.s32.totalorder %s2998_s1, %s2437_s24  ;;  %p2441_p3 = scmp.lt.u32.totalorder %s2437_s24, %s2998_s1 }
  0x2a   :  { %p2443_p4 = pnand %p2441_p3, %p2438_p2 }
  0x2c   :  { %2446 = shalt.err (!%p2443_p4)
}
  0x2d   :  { %s2447_s7 = scalar_lea.vmem %s33_s17, 1664  ;;  %p2452_p6 = scmp.lt.s32.totalorder %s33_s17, %s33_s17 }
  0x2e   :  { %p2448_p5 = scmp.ne.s32.totalorder %s33_s17, %s2447_s7  ;;  %p2453_p7 = scmp.lt.s32.totalorder %s2447_s7, %s2447_s7 }
  0x30   :  { %p2454_p8 = por %p2453_p7, %p2452_p6 }
  0x32   :  { %p2455_p9 = pnand %p2454_p8, %p2448_p5 }
  0x34   :  { %2458 = shalt.err (!%p2455_p9)
}
  0x35   :  { %38 = dma.hbm_to_vmem [thread:$0]  %s2998_s1, 1664, %s33_s17, [#allocation3], %s2559_s30, %s2559_s30, %s2560_s16  }
  0x36   :  { %s2459_s18 = scalar_lea.hbm %s3002_s5, 1664 }
  0x37   :  { %p2460_p10 = scmp.ne.s32.totalorder %s3002_s5, %s2459_s18  ;;  %p2463_p11 = scmp.lt.u32.totalorder %s2459_s18, %s3002_s5 }
  0x39   :  { %p2465_p12 = pnand %p2463_p11, %p2460_p10 }
  0x3b   :  { %2468 = shalt.err (!%p2465_p12)
}
  0x3c   :  { %s2469_s26 = scalar_lea.vmem %s2686_s20, 1664  ;;  %p2474_p0 = scmp.lt.s32.totalorder %s2686_s20, %s2686_s20 }
  0x3d   :  { %p2470_p13 = scmp.ne.s32.totalorder %s2686_s20, %s2469_s26  ;;  %p2475_p1 = scmp.lt.s32.totalorder %s2469_s26, %s2469_s26 }
  0x3f   :  { %p2476_p2 = por %p2475_p1, %p2474_p0 }
  0x41   :  { %p2477_p3 = pnand %p2476_p2, %p2470_p13 }
  0x43   :  { %2480 = shalt.err (!%p2477_p3)
}
  0x44   :  { %66 = dma.hbm_to_vmem [thread:$0]  %s3002_s5, 1664, %s2686_s20, [#allocation6], %s2559_s30, %s2559_s30, %s2560_s16  }
  0x45   :  { %s2563_s27 = smov [#allocation10]   ;;  %s2564_s7 = smov [#allocation11]  }
  0x46   :  { %s88_s28 = sshll.u32 %s2563_s27, 4  ;;  %s102_s21 = sshll.u32 %s2564_s7, 4  ;;  %s89_s28 = int_to_ptr.vmem [resolvable:$true] %s88_s28  ;;  %s2723_s21 = int_to_ptr.vmem [resolvable:$true] %s102_s21 }
  0x47   :  { %s2481_s29 = scalar_lea.hbm %s3006_s9, 1664 }
  0x48   :  { %p2482_p4 = scmp.ne.s32.totalorder %s3006_s9, %s2481_s29  ;;  %p2485_p5 = scmp.lt.u32.totalorder %s2481_s29, %s3006_s9 }
  0x4a   :  { %p2487_p6 = pnand %p2485_p5, %p2482_p4 }
  0x4c   :  { %2490 = shalt.err (!%p2487_p6)
}
  0x4d   :  { %s2491_s5 = scalar_lea.vmem %s89_s28, 1664  ;;  %p2496_p8 = scmp.lt.s32.totalorder %s89_s28, %s89_s28 }
  0x4e   :  { %p2492_p7 = scmp.ne.s32.totalorder %s89_s28, %s2491_s5  ;;  %p2497_p9 = scmp.lt.s32.totalorder %s2491_s5, %s2491_s5 }
  0x50   :  { %p2498_p10 = por %p2497_p9, %p2496_p8 }
  0x52   :  { %p2499_p11 = pnand %p2498_p10, %p2492_p7 }
  0x54   :  { %2502 = shalt.err (!%p2499_p11)
}
  0x55   :  { %94 = dma.hbm_to_vmem [thread:$0]  %s3006_s9, 1664, %s89_s28, [#allocation9], %s2559_s30, %s2559_s30, %s2560_s16  }
  0x56   :  { %s2503_s17 = scalar_lea.hbm %s3008_s11, 1664 }
  0x57   :  { %p2504_p12 = scmp.ne.s32.totalorder %s3008_s11, %s2503_s17  ;;  %p2507_p13 = scmp.lt.u32.totalorder %s2503_s17, %s3008_s11 }
  0x59   :  { %p2509_p0 = pnand %p2507_p13, %p2504_p12 }
  0x5b   :  { %2512 = shalt.err (!%p2509_p0)
}
  0x5c   :  { %s2513_s29 = scalar_lea.vmem %s2723_s21, 1664  ;;  %p2518_p2 = scmp.lt.s32.totalorder %s2723_s21, %s2723_s21 }
  0x5d   :  { %p2514_p1 = scmp.ne.s32.totalorder %s2723_s21, %s2513_s29  ;;  %p2519_p3 = scmp.lt.s32.totalorder %s2513_s29, %s2513_s29 }
  0x5f   :  { %p2520_p4 = por %p2519_p3, %p2518_p2 }
  0x61   :  { %p2521_p5 = pnand %p2520_p4, %p2514_p1 }
  0x63   :  { %2524 = shalt.err (!%p2521_p5)
}
  0x64   :  { %108 = dma.hbm_to_vmem [thread:$0]  %s3008_s11, 1664, %s2723_s21, [#allocation12], %s2559_s30, %s2559_s30, %s2560_s16  }
  0x65   :  { %2547 = dma.done.wait [#allocation3], 1664  }
  0x66   :  { %2548 = vsyncadd [#allocation3], 4294965632 }
  0x67   :  { %2549 = dma.done.wait [#allocation6], 3328  }
  0x68   :  { %2550 = vsyncadd [#allocation6], 4294963968 }
  0x69   :  { %2551 = dma.done.wait [#allocation9], 3328  }
  0x6a   :  { %2552 = vsyncadd [#allocation9], 4294963968 }
  0x6b   :  { %2553 = dma.done.wait [#allocation12], 1664  }
  0x6c   :  { %2554 = vsyncadd [#allocation12], 4294965632  ;;  %v241_v0 = vld [vmem:[#allocation5] sm:$0xff]  ;;  %v242_v1 = vld [vmem:[#allocation5 + $0x8] sm:$0xff]  ;;  %vm155_vm0 = vcmask 818176   ;;  %vm162_vm1 = vcmask 1043456   ;;  %v339_v40 = vlaneseq }
  0x6d   :  { %v135_v2 = vld [vmem:[#allocation2] sm:$0xff]  ;;  %v2191_v3 = vpack.c.bf16 %v242_v1, %v241_v0  ;;  %v136_v4 = vld [vmem:[#allocation2 + $0x8] sm:$0xff]  ;;  %v243_v5 = vld [vmem:[#allocation5 + $0x10] sm:$0xff]  ;;  %vm577_vm12 = vcmask 64512   ;;  %vm2566_vm13 = vmmov 0   ;;  %s2568_s3 = smov [#allocation13]  }
  0x6e   :  { %v244_v6 = vld [vmem:[#allocation5 + $0x18] sm:$0xff]  ;;  %v2167_v7 = vpack.c.bf16 %v136_v4, %v135_v2  ;;  %v137_v9 = vld [vmem:[#allocation2 + $0x10] sm:$0xff]  ;;  %v138_v10 = vld [vmem:[#allocation2 + $0x18] sm:$0xff]  ;;  %v2782_v41 = vand.u32 127, %v339_v40  ;;  %s1760_s19 = sshll.u32 %s2568_s3, 4  ;;  %s1761_s19 = int_to_ptr.vmem [resolvable:$true] %s1760_s19 }
  0x6f   :  { %v2195_v8 = vpack.c.bf16 %v244_v6, %v243_v5  ;;  %v245_v11 = vld [vmem:[#allocation5 + $0x20] sm:$0xff]  ;;  %2192 = vmatprep.subr.bf16.mxu1 %v2191_v3  ;;  %v2171_v12 = vpack.c.bf16 %v138_v10, %v137_v9  ;;  %v246_v13 = vld [vmem:[#allocation5 + $0x28] sm:$0xff]  ;;  %v139_v14 = vld [vmem:[#allocation2 + $0x20] sm:$0xff]  ;;  %s2525_s28 = scalar_lea.vmem %s1761_s19, 256  ;;  %p2530_p7 = scmp.lt.s32.totalorder %s1761_s19, %s1761_s19 }
  0x70   :  { %v140_v15 = vld [vmem:[#allocation2 + $0x28] sm:$0xff]  ;;  %2168 = vmatprep.subr.bf16.mxu0 %v2167_v7  ;;  %2194 = vmatpush3.bf16.msra.mxu1 %v2191_v3  ;;  %v2199_v16 = vpack.c.bf16 %v246_v13, %v245_v11  ;;  %v247_v18 = vld [vmem:[#allocation5 + $0x30] sm:$0xff]  ;;  %v248_v19 = vld [vmem:[#allocation5 + $0x38] sm:$0xff]  ;;  %vm342_vm2 = vcmp.ge.s32.totalorder %v2782_v41, 25  ;;  %vm346_vm3 = vcmp.lt.s32.totalorder %v2782_v41, 50  ;;  %vm345_vm4 = vcmp.lt.s32.totalorder %v2782_v41, 25  ;;  %p2526_p6 = scmp.ne.s32.totalorder %s1761_s19, %s2525_s28  ;;  %p2531_p8 = scmp.lt.s32.totalorder %s2525_s28, %s2525_s28 }
  0x71   :  { %2170 = vmatpush3.bf16.msra.mxu0 %v2167_v7  ;;  %2196 = vmatprep.subr.bf16.mxu1 %v2195_v8  ;;  %v2175_v17 = vpack.c.bf16 %v140_v15, %v139_v14  ;;  %v141_v20 = vld [vmem:[#allocation2 + $0x30] sm:$0xff]  ;;  %v142_v21 = vld [vmem:[#allocation2 + $0x38] sm:$0xff]  ;;  %v2763_v22 = vld [vmem:[%s2997_s0] sm:$0xff]  ;;  %v2203_v23 = vpack.c.bf16 %v248_v19, %v247_v18  ;;  %vm343_vm5 = vcmp.ge.s32.totalorder %v2782_v41, 50  ;;  %vm347_vm6 = vcmp.lt.s32.totalorder %v2782_v41, 75 }
  0x72   :  { %2172 = vmatprep.subr.bf16.mxu0 %v2171_v12  ;;  %v2179_v24 = vpack.c.bf16 %v142_v21, %v141_v20  ;;  %v249_v25 = vld [vmem:[#allocation5 + $0x40] sm:$0xff]  ;;  %v250_v26 = vld [vmem:[#allocation5 + $0x48] sm:$0xff]  ;;  %1996 = vmatprep.mubr.msk.f32.mxu1 %vm155_vm0, %v2763_v22  ;;  %v143_v27 = vld [vmem:[#allocation2 + $0x40] sm:$0xff]  ;;  %vm344_vm9 = vcmp.ge.s32.totalorder %v2782_v41, 75  ;;  %vm348_vm10 = vcmp.lt.s32.totalorder %v2782_v41, 100  ;;  %p2532_p9 = por %p2531_p8, %p2530_p7 }
  0x73   :  { %v144_v28 = vld [vmem:[#allocation2 + $0x48] sm:$0xff]  ;;  %1967 = vmatprep.mubr.msk.f32.mxu0 %vm155_vm0, %v2763_v22  ;;  %v2207_v29 = vpack.c.bf16 %v250_v26, %v249_v25  ;;  %v251_v31 = vld [vmem:[#allocation5 + $0x50] sm:$0xff]  ;;  %v252_v32 = vld [vmem:[#allocation5 + $0x58] sm:$0xff] }
  0x74   :  { %2198 = vmatpush3.bf16.msra.mxu1 %v2195_v8  ;;  %v2183_v30 = vpack.c.bf16 %v144_v28, %v143_v27  ;;  %v145_v33 = vld [vmem:[#allocation2 + $0x50] sm:$0xff]  ;;  %v146_v34 = vld [vmem:[#allocation2 + $0x58] sm:$0xff]  ;;  %v2211_v35 = vpack.c.bf16 %v252_v32, %v251_v31  ;;  %v253_v37 = vld [vmem:[#allocation5 + $0x60] sm:$0xf]  ;;  %p2533_p10 = pnand %p2532_p9, %p2526_p6 }
  0x75   :  { %2174 = vmatpush3.bf16.msra.mxu0 %v2171_v12  ;;  %2200 = vmatprep.subr.bf16.mxu1 %v2199_v16  ;;  %v2187_v36 = vpack.c.bf16 %v146_v34, %v145_v33  ;;  %v147_v38 = vld [vmem:[#allocation2 + $0x60] sm:$0xf]  ;;  %v2774_v39 = vld [vmem:[%s2997_s0 + $0x8] sm:$0xff]  ;;  %vm2796_vm7 = vmand %vm342_vm2, %vm346_vm3 }
  0x76   :  { %2176 = vmatprep.subr.bf16.mxu0 %v2175_v17  ;;  %v1779_v42 = vld [vmem:[%s3001_s4] ss:$0 sm:$0xff]  ;;  %vm2803_vm8 = vmand %vm343_vm5, %vm347_vm6 }
  0x77   :  { %v1775_v44 = vld [vmem:[%s2999_s2] ss:$0 sm:$0xff]  ;;  %vm2816_vm11 = vmand %vm344_vm9, %vm348_vm10 }
  0x78   :  { %2202 = vmatpush3.bf16.msra.mxu1 %v2199_v16 }
  0x79   :  { %2178 = vmatpush3.bf16.msra.mxu0 %v2175_v17  ;;  %2204 = vmatprep.subr.bf16.mxu1 %v2203_v23 }
  0x7a   :  { %2180 = vmatprep.subr.bf16.mxu0 %v2179_v24 }
  0x7c   :  { %2206 = vmatpush3.bf16.msra.mxu1 %v2203_v23 }
  0x7d   :  { %2182 = vmatpush3.bf16.msra.mxu0 %v2179_v24  ;;  %2208 = vmatprep.subr.bf16.mxu1 %v2207_v29 }
  0x7e   :  { %2184 = vmatprep.subr.bf16.mxu0 %v2183_v30 }
  0x80   :  { %2210 = vmatpush3.bf16.msra.mxu1 %v2207_v29 }
  0x81   :  { %2186 = vmatpush3.bf16.msra.mxu0 %v2183_v30  ;;  %2212 = vmatprep.subr.bf16.mxu1 %v2211_v35 }
  0x82   :  { %2188 = vmatprep.subr.bf16.mxu0 %v2187_v36 }
  0x84   :  { %2214 = vmatpush3.bf16.msra.mxu1 %v2211_v35 }
  0x85   :  { %2190 = vmatpush3.bf16.msra.mxu0 %v2187_v36  ;;  %1994 = vmatprep.subr.msk.mxu1 %vm162_vm1, %v253_v37 }
  0x86   :  { %1965 = vmatprep.subr.msk.mxu0 %vm162_vm1, %v147_v38 }
  0x88   :  { %1995 = vmatpush3.msk.msra.mxu1 %vm162_vm1, %v253_v37 }
  0x89   :  { %1966 = vmatpush3.msk.msra.mxu0 %vm162_vm1, %v147_v38  ;;  %1997 = vmatmul.mubr.msk.f32.vlgmr.msra.gmra.mrb[0].mxu1 %vm155_vm0, %v2774_v39 }
  0x8a   :  { %1968 = vmatmul.mubr.msk.f32.vlgmr.msra.gmra.mrb[0].mxu0 %vm155_vm0, %v2774_v39 }
 0x15c   :  { %v1998_v43 = vpop.f32.mrb[0].mxu1 }
 0x15d   :  { %v1969_v45 = vpop.f32.mrb[0].mxu0  ;;  %v330_v46 = vpop.f32.mrb[1].mxu1  ;;  %v336_v50 = vadd.f32 %v1998_v43, %v1779_v42 }
 0x15e   :  { %v331_v47 = vadd.f32 %v1779_v42, %v330_v46  ;;  %v232_v48 = vpop.f32.mrb[1].mxu0  ;;  %v238_v55 = vadd.f32 %v1969_v45, %v1775_v44 }
 0x15f   :  { %v233_v49 = vadd.f32 %v1775_v44, %v232_v48 }
 0x160   :  { %1999 = vmatprep.subr.msk.mxu0 %vm155_vm0, %v331_v47  ;;  %v365_v59 = vsel %vm345_vm4, %v238_v55, 0.0  ;;  %v366_v60 = vsel %vm2796_vm7, %v238_v55, 0.0  ;;  %v367_v61 = vsel %vm2803_vm8, %v238_v55, 0.0  ;;  %v368_v62 = vsel %vm2816_vm11, %v238_v55, 0.0 }
 0x161   :  { %2000 = vmatpush3.xpose.msk.msra.mxu0 %vm155_vm0, %v331_v47  ;;  %v361_v52 = vsel %vm345_vm4, %v233_v49, 0.0  ;;  %v362_v54 = vsel %vm2796_vm7, %v233_v49, 0.0  ;;  %v363_v56 = vsel %vm2803_vm8, %v233_v49, 0.0  ;;  %v364_v58 = vsel %vm2816_vm11, %v233_v49, 0.0 }
 0x162   :  { %2001 = vmatprep.mubr.msk.f32.mxu0 %vm155_vm0, %v361_v52  ;;  %2007 = vmatprep.subr.msk.mxu0 %vm155_vm0, %v336_v50 }
 0x164   :  { %2002 = vmatmul.mubr.msk.f32.vlgmr.msra.gmra.mrb[2].mxu0 %vm155_vm0, %v362_v54 }
 0x165   :  { %2004 = vmatprep.mubr.msk.f32.mxu0 %vm155_vm0, %v363_v56  ;;  %2008 = vmatpush3.xpose.msk.msra.mxu0 %vm155_vm0, %v336_v50 }
 0x168   :  { %2005 = vmatmul.mubr.msk.f32.gmra.mrb[4].mxu0 %vm155_vm0, %v364_v58 }
 0x169   :  { %2009 = vmatprep.mubr.msk.f32.mxu0 %vm155_vm0, %v365_v59 }
 0x16c   :  { %2010 = vmatmul.mubr.msk.f32.vlgmr.msra.gmra.mrb[6].mxu0 %vm155_vm0, %v366_v60 }
 0x16d   :  { %2012 = vmatprep.mubr.msk.f32.mxu0 %vm155_vm0, %v367_v61 }
 0x170   :  { %2013 = vmatmul.mubr.msk.f32.gmra.mrb[8].mxu0 %vm155_vm0, %v368_v62 }
 0x237   :  { %v2003_v63 = vpop.f32.mrb[2].mxu0 }
 0x238   :  { %v570_v0 = vmul.f32 0.2, %v2003_v63  ;;  %v450_v1 = vpop.f32.mrb[3].mxu0 }
 0x239   :  { %v569_v2 = vmul.f32 0.2, %v450_v1 }
 0x23a   :  { %v581_v3 = vsel %vm577_vm12, %v570_v0, -inf }
 0x23b   :  { %582 = vmax.xlane.f32.xlu0 %v581_v3  ;;  %v2006_v4 = vpop.f32.mrb[4].mxu0  ;;  %v578_v8 = vsel %vm577_vm12, %v569_v2, -inf }
 0x23c   :  { %v572_v5 = vmul.f32 0.2, %v2006_v4  ;;  %v460_v6 = vpop.f32.mrb[5].mxu0 }
 0x23d   :  { %v571_v7 = vmul.f32 0.2, %v460_v6 }
 0x23e   :  { %v587_v9 = vsel %vm577_vm12, %v572_v5, -inf }
 0x23f   :  { %579 = vmax.xlane.f32.xlu0 %v578_v8  ;;  %588 = vmax.xlane.f32.xlu1 %v587_v9  ;;  %v2011_v10 = vpop.f32.mrb[6].mxu0  ;;  %v584_v14 = vsel %vm577_vm12, %v571_v7, -inf }
 0x240   :  { %v550_v11 = vpop.f32.mrb[7].mxu0  ;;  %v574_v13 = vmul.f32 0.2, %v2011_v10 }
 0x241   :  { %v573_v12 = vmul.f32 0.2, %v550_v11 }
 0x242   :  { %v593_v20 = vsel %vm577_vm12, %v574_v13, -inf }
 0x243   :  { %585 = vmax.xlane.f32.xlu1 %v584_v14  ;;  %v2014_v15 = vpop.f32.mrb[8].mxu0  ;;  %v590_v16 = vsel %vm577_vm12, %v573_v12, -inf }
 0x244   :  { %591 = vmax.xlane.f32.xlu0 %v590_v16  ;;  %v560_v17 = vpop.f32.mrb[9].mxu0  ;;  %v576_v19 = vmul.f32 0.2, %v2014_v15 }
 0x245   :  { %v575_v18 = vmul.f32 0.2, %v560_v17 }
 0x246   :  { %v599_v23 = vsel %vm577_vm12, %v576_v19, -inf }
 0x247   :  { %594 = vmax.xlane.f32.xlu1 %v593_v20  ;;  %v596_v21 = vsel %vm577_vm12, %v575_v18, -inf }
 0x248   :  { %597 = vmax.xlane.f32.xlu0 %v596_v21 }
 0x24b   :  { %600 = vmax.xlane.f32.xlu1 %v599_v23 }
 0x2c8   :  { %v583_v24 = vpop.xlane.xlu0 %582 }
 0x2c9   :  { %v603_v25 = vsub.f32 %v570_v0, %v583_v24 }
 0x2cb   :  { %v612_v26 = vmul.f32 1.442695, %v603_v25 }
 0x2cc   :  { %v580_v27 = vpop.xlane.xlu0 %579  ;;  %v589_v28 = vpop.xlane.xlu1 %588 }
 0x2cd   :  { %2325 = vpow2.f32 %v612_v26  ;;  %v602_v29 = vsub.f32 %v569_v2, %v580_v27  ;;  %v605_v30 = vsub.f32 %v572_v5, %v589_v28  ;;  %v2565_v5 = vmov 0.0  }
 0x2ce   :  { %2015 = vmatprep.subr.mxu0 %v2565_v5  ;;  %2017 = vmatprep.mubr.msk.f32.mxu0 %vm2566_vm13, %v2565_v5 }
 0x2cf   :  { %v610_v31 = vmul.f32 1.442695, %v602_v29  ;;  %v616_v32 = vmul.f32 1.442695, %v605_v30  ;;  %2016 = vmatpush3.msra.mxu0 %v2763_v22 }
 0x2d0   :  { %v586_v33 = vpop.xlane.xlu1 %585  ;;  %2020 = vmatprep.subr.mxu0 %v2565_v5 }
 0x2d1   :  { %2327 = vpow2.f32 %v610_v31  ;;  %v604_v34 = vsub.f32 %v571_v7, %v586_v33  ;;  %v592_v35 = vpop.xlane.xlu0 %591  ;;  %v829_v31 = vld [vmem:[#allocation7] sm:$0xff] }
 0x2d2   :  { %2329 = vpow2.f32 %v616_v32  ;;  %v606_v36 = vsub.f32 %v573_v12, %v592_v35  ;;  %v830_v32 = vld [vmem:[#allocation7 + $0x8] sm:$0xff] }
 0x2d3   :  { %v614_v37 = vmul.f32 1.442695, %v604_v34 }
 0x2d4   :  { %v618_v38 = vmul.f32 1.442695, %v606_v36  ;;  %v595_v40 = vpop.xlane.xlu1 %594 }
 0x2d5   :  { %2331 = vpow2.f32 %v614_v37  ;;  %v607_v42 = vsub.f32 %v574_v13, %v595_v40  ;;  %v598_v43 = vpop.xlane.xlu0 %597  ;;  %v2215_v40 = vpack.c.bf16 %v830_v32, %v829_v31  ;;  %v1044_v31 = vld [vmem:[#allocation10 + $0x28] sm:$0xff] }
 0x2d6   :  { %v608_v44 = vsub.f32 %v575_v18, %v598_v43  ;;  %2333 = vpow2.f32 %v618_v38 }
 0x2d7   :  { %v2326_v45 = vpop.eup %2325  ;;  %v620_v46 = vmul.f32 1.442695, %v607_v42 }
 0x2d8   :  { %v622_v47 = vmul.f32 1.442695, %v608_v44  ;;  %v601_v48 = vpop.xlane.xlu1 %600  ;;  %v629_v49 = vsel %vm577_vm12, %v2326_v45, 0.0 }
 0x2d9   :  { %2335 = vpow2.f32 %v620_v46  ;;  %v609_v50 = vsub.f32 %v576_v19, %v601_v48  ;;  %630 = vadd.xlane.f32.xlu1 %v629_v49  ;;  %v831_v49 = vld [vmem:[#allocation7 + $0x10] sm:$0xff] }
 0x2da   :  { %2337 = vpow2.f32 %v622_v47 }
 0x2db   :  { %v2328_v52 = vpop.eup %2327  ;;  %v624_v54 = vmul.f32 1.442695, %v609_v50  ;;  %v832_v50 = vld [vmem:[#allocation7 + $0x18] sm:$0xff] }
 0x2dc   :  { %v2330_v55 = vpop.eup %2329  ;;  %v626_v56 = vsel %vm577_vm12, %v2328_v52, 0.0 }
 0x2dd   :  { %2339 = vpow2.f32 %v624_v54  ;;  %v635_v58 = vsel %vm577_vm12, %v2330_v55, 0.0  ;;  %627 = vadd.xlane.f32.xlu0 %v626_v56  ;;  %v833_v56 = vld [vmem:[#allocation7 + $0x20] sm:$0xff] }
 0x2de   :  { %636 = vadd.xlane.f32.xlu1 %v635_v58  ;;  %v834_v58 = vld [vmem:[#allocation7 + $0x28] sm:$0xff] }
 0x2df   :  { %v2332_v59 = vpop.eup %2331 }
 0x2e0   :  { %v632_v60 = vsel %vm577_vm12, %v2332_v59, 0.0  ;;  %v2334_v61 = vpop.eup %2333 }
 0x2e1   :  { %633 = vadd.xlane.f32.xlu0 %v632_v60  ;;  %v638_v0 = vsel %vm577_vm12, %v2334_v61, 0.0  ;;  %v836_v60 = vld [vmem:[#allocation7 + $0x38] sm:$0xff] }
 0x2e3   :  { %v2336_v62 = vpop.eup %2335 }
 0x2e4   :  { %v641_v63 = vsel %vm577_vm12, %v2336_v62, 0.0  ;;  %v2338_v1 = vpop.eup %2337 }
 0x2e5   :  { %642 = vadd.xlane.f32.xlu1 %v641_v63  ;;  %639 = vadd.xlane.f32.xlu0 %v638_v0  ;;  %v644_v4 = vsel %vm577_vm12, %v2338_v1, 0.0  ;;  %v838_v63 = vld [vmem:[#allocation7 + $0x48] sm:$0xff] }
 0x2e7   :  { %v2340_v2 = vpop.eup %2339 }
 0x2e8   :  { %v647_v3 = vsel %vm577_vm12, %v2340_v2, 0.0 }
 0x2e9   :  { %648 = vadd.xlane.f32.xlu1 %v647_v3  ;;  %645 = vadd.xlane.f32.xlu0 %v644_v4  ;;  %v841_v4 = vld [vmem:[#allocation7 + $0x60] sm:$0xf] }
 0x366   :  { %v631_v6 = vpop.xlane.xlu1 %630 }
 0x367   :  { %2341 = vrcp.f32 %v631_v6  ;;  %v935_v6 = vld [vmem:[#allocation8] sm:$0xff] }
 0x36a   :  { %v628_v7 = vpop.xlane.xlu0 %627 }
 0x36b   :  { %v637_v8 = vpop.xlane.xlu1 %636  ;;  %2343 = vrcp.f32 %v628_v7  ;;  %v936_v7 = vld [vmem:[#allocation8 + $0x8] sm:$0xff] }
 0x36c   :  { %2345 = vrcp.f32 %v637_v8  ;;  %v1039_v8 = vld [vmem:[#allocation10] sm:$0xff] }
 0x36e   :  { %v634_v9 = vpop.xlane.xlu0 %633 }
 0x36f   :  { %2347 = vrcp.f32 %v634_v9  ;;  %v2239_v9 = vpack.c.bf16 %v936_v7, %v935_v6 }
 0x371   :  { %v2342_v12 = vpop.eup %2341  ;;  %2240 = vmatprep.subr.bf16.mxu1 %v2239_v9 }
 0x372   :  { %v643_v10 = vpop.xlane.xlu1 %642  ;;  %v640_v11 = vpop.xlane.xlu0 %639  ;;  %v659_v13 = vmul.f32 %v2342_v12, %v2326_v45  ;;  %v938_v12 = vld [vmem:[#allocation8 + $0x18] sm:$0xff]  ;;  %2242 = vmatpush3.bf16.msra.mxu1 %v2239_v9 }
 0x373   :  { %2349 = vrcp.f32 %v643_v10  ;;  %v1040_v10 = vld [vmem:[#allocation10 + $0x8] sm:$0xff] }
 0x374   :  { %2351 = vrcp.f32 %v640_v11  ;;  %v667_v20 = vsel %vm577_vm12, %v659_v13, 0.0  ;;  %v937_v11 = vld [vmem:[#allocation8 + $0x10] sm:$0xff] }
 0x375   :  { %v2344_v22 = vpop.eup %2343  ;;  %v2243_v13 = vpack.c.bf16 %v938_v12, %v937_v11 }
 0x376   :  { %v658_v14 = vmul.f32 %v2344_v22, %v2328_v52  ;;  %v649_v15 = vpop.xlane.xlu1 %648  ;;  %v646_v16 = vpop.xlane.xlu0 %645  ;;  %v2263_v22 = vpack.c.bf16 %v1040_v10, %v1039_v8 }
 0x377   :  { %v2346_v17 = vpop.eup %2345  ;;  %2353 = vrcp.f32 %v649_v15  ;;  %2244 = vmatprep.subr.bf16.mxu1 %v2243_v13  ;;  %v940_v15 = vld [vmem:[#allocation8 + $0x28] sm:$0xff] }
 0x378   :  { %v666_v18 = vsel %vm577_vm12, %v658_v14, 0.0  ;;  %2355 = vrcp.f32 %v646_v16  ;;  %v661_v21 = vmul.f32 %v2346_v17, %v2330_v55  ;;  %v2219_v55 = vpack.c.bf16 %v832_v50, %v831_v49  ;;  %v939_v14 = vld [vmem:[#allocation8 + $0x20] sm:$0xff]  ;;  %2246 = vmatpush3.bf16.msra.mxu1 %v2243_v13  ;;  %v941_v17 = vld [vmem:[#allocation8 + $0x30] sm:$0xff]  ;;  %v1051_v49 = vld [vmem:[#allocation10 + $0x60] sm:$0xf] }
 0x379   :  { %v2348_v19 = vpop.eup %2347  ;;  %v668_v24 = vadd.f32 %v667_v20, %v666_v18  ;;  %v2247_v16 = vpack.c.bf16 %v940_v15, %v939_v14  ;;  %v942_v18 = vld [vmem:[#allocation8 + $0x38] sm:$0xff]  ;;  %v943_v20 = vld [vmem:[#allocation8 + $0x40] sm:$0xff]  ;;  %v1795_v50 = vld [vmem:[%s3003_s6] ss:$0 sm:$0xff] }
 0x37a   :  { %v660_v23 = vmul.f32 %v2348_v19, %v2332_v59  ;;  %v671_v29 = vsel %vm577_vm12, %v661_v21, 0.0  ;;  %v835_v59 = vld [vmem:[#allocation7 + $0x30] sm:$0xff]  ;;  %v2251_v19 = vpack.c.bf16 %v942_v18, %v941_v17 }
 0x37b   :  { %2248 = vmatprep.subr.bf16.mxu1 %v2247_v16  ;;  %v944_v21 = vld [vmem:[#allocation8 + $0x48] sm:$0xff] }
 0x37c   :  { %v669_v25 = vsel %vm577_vm12, %v660_v23, 0.0  ;;  %2250 = vmatpush3.bf16.msra.mxu1 %v2247_v16  ;;  %v2255_v23 = vpack.c.bf16 %v944_v21, %v943_v20 }
 0x37d   :  { %v2350_v26 = vpop.eup %2349  ;;  %v670_v27 = vadd.f32 %v669_v25, %v668_v24  ;;  %2252 = vmatprep.subr.bf16.mxu1 %v2251_v19 }
 0x37e   :  { %v2352_v28 = vpop.eup %2351  ;;  %v663_v30 = vmul.f32 %v2350_v26, %v2336_v62  ;;  %v837_v62 = vld [vmem:[#allocation7 + $0x40] sm:$0xff] }
 0x37f   :  { %v672_v33 = vadd.f32 %v671_v29, %v670_v27  ;;  %v662_v34 = vmul.f32 %v2352_v28, %v2334_v61  ;;  %v2227_v61 = vpack.c.bf16 %v836_v60, %v835_v59  ;;  %v2231_v0 = vpack.c.bf16 %v838_v63, %v837_v62  ;;  %v1041_v26 = vld [vmem:[#allocation10 + $0x10] sm:$0xff]  ;;  %v1042_v27 = vld [vmem:[#allocation10 + $0x18] sm:$0xff]  ;;  %v1799_v59 = vld [vmem:[%s3005_s8] ss:$0 sm:$0xff] }
 0x380   :  { %v674_v37 = vsel %vm577_vm12, %v663_v30, 0.0  ;;  %2254 = vmatpush3.bf16.msra.mxu1 %v2251_v19  ;;  %v2267_v28 = vpack.c.bf16 %v1042_v27, %v1041_v26  ;;  %v1043_v30 = vld [vmem:[#allocation10 + $0x20] sm:$0xff] }
 0x381   :  { %v2354_v35 = vpop.eup %2353  ;;  %v681_v36 = vmul.f32 0.25, %v672_v33  ;;  %v673_v38 = vsel %vm577_vm12, %v662_v34, 0.0  ;;  %2256 = vmatprep.subr.bf16.mxu1 %v2255_v23  ;;  %v2271_v33 = vpack.c.bf16 %v1044_v31, %v1043_v30  ;;  %v1045_v34 = vld [vmem:[#allocation10 + $0x30] sm:$0xff]  ;;  %v1803_v60 = vld [vmem:[%s3007_s10] ss:$0 sm:$0xff] }
 0x382   :  { %v2356_v42 = vpop.eup %2355  ;;  %v665_v43 = vmul.f32 %v2354_v35, %v2340_v2  ;;  %v675_v45 = vadd.f32 %v674_v37, %v673_v38  ;;  %v840_v2 = vld [vmem:[#allocation7 + $0x58] sm:$0xff]  ;;  %v1046_v35 = vld [vmem:[#allocation10 + $0x38] sm:$0xff]  ;;  %v1047_v37 = vld [vmem:[#allocation10 + $0x40] sm:$0xff] }
 0x383   :  { %v664_v44 = vmul.f32 %v2356_v42, %v2338_v1  ;;  %2018 = vmatmul.mubr.msk.f32.vlgmr.msra.gmra.mrb[10].mxu0 %vm577_vm12, %v681_v36  ;;  %v839_v1 = vld [vmem:[#allocation7 + $0x50] sm:$0xff]  ;;  %v2275_v36 = vpack.c.bf16 %v1046_v35, %v1045_v34  ;;  %v1048_v38 = vld [vmem:[#allocation10 + $0x48] sm:$0xff] }
 0x384   :  { %2021 = vmatpush3.msra.mxu0 %v2774_v39  ;;  %2022 = vmatprep.mubr.msk.f32.mxu0 %vm2566_vm13, %v2565_v5  ;;  %v678_v48 = vsel %vm577_vm12, %v665_v43, 0.0  ;;  %v2223_v39 = vpack.c.bf16 %v834_v58, %v833_v56  ;;  %v2235_v3 = vpack.c.bf16 %v840_v2, %v839_v1  ;;  %v945_v42 = vld [vmem:[#allocation8 + $0x50] sm:$0xff]  ;;  %v946_v43 = vld [vmem:[#allocation8 + $0x58] sm:$0xff] }
 0x385   :  { %v676_v46 = vsel %vm577_vm12, %v664_v44, 0.0  ;;  %2216 = vmatprep.subr.bf16.mxu0 %v2215_v40  ;;  %2258 = vmatpush3.bf16.msra.mxu1 %v2255_v23  ;;  %v1049_v44 = vld [vmem:[#allocation10 + $0x50] sm:$0xff] }
 0x386   :  { %v677_v47 = vadd.f32 %v676_v46, %v675_v45  ;;  %v2259_v45 = vpack.c.bf16 %v946_v43, %v945_v42  ;;  %v1050_v46 = vld [vmem:[#allocation10 + $0x58] sm:$0xff] }
 0x388   :  { %v679_v52 = vadd.f32 %v678_v48, %v677_v47  ;;  %v2283_v47 = vpack.c.bf16 %v1050_v46, %v1049_v44  ;;  %2260 = vmatprep.subr.bf16.mxu1 %v2259_v45  ;;  %v947_v48 = vld [vmem:[#allocation8 + $0x60] sm:$0xf] }
 0x389   :  { %2262 = vmatpush3.bf16.msra.mxu1 %v2259_v45 }
 0x38a   :  { %v682_v54 = vmul.f32 0.25, %v679_v52  ;;  %2078 = vmatprep.subr.msk.mxu1 %vm162_vm1, %v947_v48 }
 0x38c   :  { %2023 = vmatmul.mubr.msk.f32.vlgmr.msra.gmra.mrb[12].mxu0 %vm577_vm12, %v682_v54 }
 0x38d   :  { %2218 = vmatpush3.bf16.msra.mxu0 %v2215_v40  ;;  %v2279_v40 = vpack.c.bf16 %v1048_v38, %v1047_v37  ;;  %2079 = vmatpush3.msk.msra.mxu1 %vm162_vm1, %v947_v48 }
 0x38e   :  { %2220 = vmatprep.subr.bf16.mxu0 %v2219_v55 }
 0x391   :  { %2222 = vmatpush3.bf16.msra.mxu0 %v2219_v55 }
 0x392   :  { %2224 = vmatprep.subr.bf16.mxu0 %v2223_v39 }
 0x395   :  { %2226 = vmatpush3.bf16.msra.mxu0 %v2223_v39 }
 0x396   :  { %2228 = vmatprep.subr.bf16.mxu0 %v2227_v61 }
 0x399   :  { %2230 = vmatpush3.bf16.msra.mxu0 %v2227_v61 }
 0x39a   :  { %2232 = vmatprep.subr.bf16.mxu0 %v2231_v0 }
 0x39d   :  { %2234 = vmatpush3.bf16.msra.mxu0 %v2231_v0 }
 0x39e   :  { %2236 = vmatprep.subr.bf16.mxu0 %v2235_v3 }
 0x3a1   :  { %2238 = vmatpush3.bf16.msra.mxu0 %v2235_v3 }
 0x3a2   :  { %2049 = vmatprep.subr.msk.mxu0 %vm162_vm1, %v841_v4 }
 0x3a5   :  { %2050 = vmatpush3.msk.msra.mxu0 %vm162_vm1, %v841_v4 }
 0x3a6   :  { %2264 = vmatprep.subr.bf16.mxu0 %v2263_v22 }
 0x456   :  { %v752_v24 = vpop.f32.mrb[10].mxu0 }
 0x457   :  { %v2019_v25 = vpop.f32.mrb[11].mxu0  ;;  %2051 = vmatprep.mubr.msk.f32.mxu0 %vm155_vm0, %v752_v24 }
 0x45f   :  { %v825_v29 = vpop.f32.mrb[12].mxu0 }
 0x460   :  { %v2024_v32 = vpop.f32.mrb[13].mxu0  ;;  %2052 = vmatmul.mubr.msk.f32.vlgmr.msra.gmra.mrb[14].mxu0 %vm155_vm0, %v825_v29 }
 0x461   :  { %2266 = vmatpush3.bf16.msra.mxu0 %v2263_v22 }
 0x462   :  { %2268 = vmatprep.subr.bf16.mxu0 %v2267_v28 }
 0x465   :  { %2270 = vmatpush3.bf16.msra.mxu0 %v2267_v28 }
 0x466   :  { %2272 = vmatprep.subr.bf16.mxu0 %v2271_v33 }
 0x469   :  { %2274 = vmatpush3.bf16.msra.mxu0 %v2271_v33 }
 0x46a   :  { %2276 = vmatprep.subr.bf16.mxu0 %v2275_v36 }
 0x46d   :  { %2278 = vmatpush3.bf16.msra.mxu0 %v2275_v36 }
 0x46e   :  { %2280 = vmatprep.subr.bf16.mxu0 %v2279_v40 }
 0x471   :  { %2282 = vmatpush3.bf16.msra.mxu0 %v2279_v40 }
 0x472   :  { %2284 = vmatprep.subr.bf16.mxu0 %v2283_v47 }
 0x475   :  { %2286 = vmatpush3.bf16.msra.mxu0 %v2283_v47 }
 0x476   :  { %2107 = vmatprep.subr.msk.mxu0 %vm162_vm1, %v1051_v49 }
 0x479   :  { %2108 = vmatpush3.msk.msra.mxu0 %vm162_vm1, %v1051_v49 }
 0x533   :  { %v2053_v52 = vpop.f32.mrb[14].mxu0 }
 0x534   :  { %v930_v54 = vadd.f32 %v2053_v52, %v1795_v50  ;;  %v924_v55 = vpop.f32.mrb[15].mxu0 }
 0x535   :  { %v925_v56 = vadd.f32 %v1795_v50, %v924_v55 }
 0x536   :  { %v2882_v39 = vmax.f32 %v930_v54, 0.0 }
 0x537   :  { %v933_v58 = vmax.f32 %v925_v56, 0.0 }
 0x539   :  { %2080 = vmatprep.mubr.msk.f32.mxu1 %vm155_vm0, %v933_v58  ;;  %2109 = vmatprep.mubr.msk.f32.mxu0 %vm155_vm0, %v933_v58 }
 0x53a   :  { %2081 = vmatmul.mubr.msk.f32.vlgmr.msra.gmra.mrb[2].mxu1 %vm155_vm0, %v2882_v39  ;;  %2110 = vmatmul.mubr.msk.f32.vlgmr.msra.gmra.mrb[16].mxu0 %vm155_vm0, %v2882_v39 }
 0x60d   :  { %v2082_v61 = vpop.f32.mrb[2].mxu1  ;;  %v2111_v62 = vpop.f32.mrb[16].mxu0 }
 0x60e   :  { %v1030_v63 = vpop.f32.mrb[3].mxu1  ;;  %v1128_v0 = vpop.f32.mrb[17].mxu0  ;;  %v1134_v3 = vadd.f32 %v2111_v62, %v1803_v60  ;;  %v1036_v7 = vadd.f32 %v2082_v61, %v1799_v59 }
 0x60f   :  { %v1031_v1 = vadd.f32 %v1799_v59, %v1030_v63  ;;  %v1129_v2 = vadd.f32 %v1803_v60, %v1128_v0 }
 0x610   :  { %v1141_v10 = vsel %vm345_vm4, %v1036_v7, 0.0  ;;  %v1142_v11 = vsel %vm2796_vm7, %v1036_v7, 0.0  ;;  %v1143_v12 = vsel %vm2803_vm8, %v1036_v7, 0.0  ;;  %v1144_v22 = vsel %vm2816_vm11, %v1036_v7, 0.0 }
 0x611   :  { %2112 = vmatprep.subr.msk.mxu1 %vm155_vm0, %v1129_v2  ;;  %v1137_v4 = vsel %vm345_vm4, %v1031_v1, 0.0  ;;  %v1138_v6 = vsel %vm2796_vm7, %v1031_v1, 0.0  ;;  %v1139_v8 = vsel %vm2803_vm8, %v1031_v1, 0.0  ;;  %v1140_v9 = vsel %vm2816_vm11, %v1031_v1, 0.0 }
 0x612   :  { %2113 = vmatpush3.xpose.msk.msra.mxu1 %vm155_vm0, %v1129_v2  ;;  %2114 = vmatprep.mubr.msk.f32.mxu1 %vm155_vm0, %v1137_v4 }
 0x613   :  { %2120 = vmatprep.subr.msk.mxu1 %vm155_vm0, %v1134_v3 }
 0x615   :  { %2115 = vmatmul.mubr.msk.f32.vlgmr.msra.gmra.mrb[4].mxu1 %vm155_vm0, %v1138_v6 }
 0x616   :  { %2117 = vmatprep.mubr.msk.f32.mxu1 %vm155_vm0, %v1139_v8  ;;  %2121 = vmatpush3.xpose.msk.msra.mxu1 %vm155_vm0, %v1134_v3 }
 0x617   :  { %2128 = vmatprep.subr.mxu1 %v2565_v5 }
 0x619   :  { %2118 = vmatmul.mubr.msk.f32.gmra.mrb[6].mxu1 %vm155_vm0, %v1140_v9 }
 0x61a   :  { %2122 = vmatprep.mubr.msk.f32.mxu1 %vm155_vm0, %v1141_v10 }
 0x61d   :  { %2123 = vmatmul.mubr.msk.f32.vlgmr.msra.gmra.mrb[8].mxu1 %vm155_vm0, %v1142_v11 }
 0x61e   :  { %2129 = vmatpush3.msra.mxu1 %v933_v58  ;;  %2125 = vmatprep.mubr.msk.f32.mxu1 %vm155_vm0, %v1143_v12 }
 0x61f   :  { %2133 = vmatprep.subr.mxu1 %v2565_v5 }
 0x621   :  { %2126 = vmatmul.mubr.msk.f32.gmra.mrb[10].mxu1 %vm155_vm0, %v1144_v22 }
 0x622   :  { %2130 = vmatprep.mubr.msk.f32.mxu1 %vm2566_vm13, %v2565_v5 }
 0x6e8   :  { %v2116_v41 = vpop.f32.mrb[4].mxu1 }
 0x6e9   :  { %v1346_v51 = vmul.f32 0.2, %v2116_v41  ;;  %v1226_v13 = vpop.f32.mrb[5].mxu1 }
 0x6ea   :  { %v1345_v14 = vmul.f32 0.2, %v1226_v13 }
 0x6eb   :  { %v1356_v53 = vsel %vm577_vm12, %v1346_v51, -inf }
 0x6ec   :  { %1357 = vmax.xlane.f32.xlu1 %v1356_v53  ;;  %v2119_v15 = vpop.f32.mrb[6].mxu1  ;;  %v1353_v16 = vsel %vm577_vm12, %v1345_v14, -inf }
 0x6ed   :  { %v1348_v17 = vmul.f32 0.2, %v2119_v15  ;;  %1354 = vmax.xlane.f32.xlu0 %v1353_v16  ;;  %v1236_v18 = vpop.f32.mrb[7].mxu1 }
 0x6ee   :  { %v1347_v57 = vmul.f32 0.2, %v1236_v18 }
 0x6ef   :  { %v1362_v19 = vsel %vm577_vm12, %v1348_v17, -inf }
 0x6f0   :  { %1363 = vmax.xlane.f32.xlu1 %v1362_v19  ;;  %v2124_v20 = vpop.f32.mrb[8].mxu1  ;;  %v1359_v21 = vsel %vm577_vm12, %v1347_v57, -inf }
 0x6f1   :  { %v1350_v23 = vmul.f32 0.2, %v2124_v20  ;;  %1360 = vmax.xlane.f32.xlu0 %v1359_v21  ;;  %v1326_v24 = vpop.f32.mrb[9].mxu1 }
 0x6f2   :  { %v1349_v25 = vmul.f32 0.2, %v1326_v24 }
 0x6f3   :  { %v1368_v26 = vsel %vm577_vm12, %v1350_v23, -inf }
 0x6f4   :  { %1369 = vmax.xlane.f32.xlu1 %v1368_v26  ;;  %v2127_v27 = vpop.f32.mrb[10].mxu1  ;;  %v1365_v28 = vsel %vm577_vm12, %v1349_v25, -inf }
 0x6f5   :  { %v1352_v29 = vmul.f32 0.2, %v2127_v27  ;;  %1366 = vmax.xlane.f32.xlu0 %v1365_v28  ;;  %v1336_v30 = vpop.f32.mrb[11].mxu1 }
 0x6f6   :  { %v1351_v31 = vmul.f32 0.2, %v1336_v30 }
 0x6f7   :  { %v1374_v32 = vsel %vm577_vm12, %v1352_v29, -inf }
 0x6f8   :  { %1375 = vmax.xlane.f32.xlu1 %v1374_v32  ;;  %v1371_v33 = vsel %vm577_vm12, %v1351_v31, -inf }
 0x6f9   :  { %1372 = vmax.xlane.f32.xlu0 %v1371_v33 }
 0x779   :  { %v1358_v34 = vpop.xlane.xlu1 %1357 }
 0x77a   :  { %v1378_v35 = vsub.f32 %v1346_v51, %v1358_v34  ;;  %v1355_v36 = vpop.xlane.xlu0 %1354 }
 0x77b   :  { %v1377_v37 = vsub.f32 %v1345_v14, %v1355_v36 }
 0x77c   :  { %v1387_v38 = vmul.f32 1.442695, %v1378_v35 }
 0x77d   :  { %v1385_v40 = vmul.f32 1.442695, %v1377_v37  ;;  %v1364_v42 = vpop.xlane.xlu1 %1363 }
 0x77e   :  { %2357 = vpow2.f32 %v1387_v38  ;;  %v1380_v43 = vsub.f32 %v1348_v17, %v1364_v42  ;;  %v1361_v44 = vpop.xlane.xlu0 %1360  ;;  %v1603_v38 = vld [vmem:[#allocation11] sm:$0xff] }
 0x77f   :  { %2359 = vpow2.f32 %v1385_v40  ;;  %v1379_v45 = vsub.f32 %v1347_v57, %v1361_v44  ;;  %v1604_v40 = vld [vmem:[#allocation11 + $0x8] sm:$0xff] }
 0x780   :  { %v1391_v46 = vmul.f32 1.442695, %v1380_v43 }
 0x781   :  { %v1389_v47 = vmul.f32 1.442695, %v1379_v45  ;;  %v1370_v48 = vpop.xlane.xlu1 %1369 }
 0x782   :  { %2361 = vpow2.f32 %v1391_v46  ;;  %v1382_v49 = vsub.f32 %v1350_v23, %v1370_v48  ;;  %v1367_v50 = vpop.xlane.xlu0 %1366  ;;  %v2287_v48 = vpack.c.bf16 %v1604_v40, %v1603_v38  ;;  %v1732_v38 = vld [vmem:[%s3011_s14] sm:$0xff] }
 0x783   :  { %2363 = vpow2.f32 %v1389_v47  ;;  %v1381_v52 = vsub.f32 %v1349_v25, %v1367_v50 }
 0x784   :  { %v1395_v54 = vmul.f32 1.442695, %v1382_v49 }
 0x785   :  { %v1393_v55 = vmul.f32 1.442695, %v1381_v52  ;;  %v1376_v56 = vpop.xlane.xlu1 %1375 }
 0x786   :  { %2365 = vpow2.f32 %v1395_v54  ;;  %v1384_v58 = vsub.f32 %v1352_v29, %v1376_v56  ;;  %v1373_v59 = vpop.xlane.xlu0 %1372 }
 0x787   :  { %2367 = vpow2.f32 %v1393_v55  ;;  %v1383_v60 = vsub.f32 %v1351_v31, %v1373_v59  ;;  %v1606_v59 = vld [vmem:[#allocation11 + $0x18] sm:$0xff] }
 0x788   :  { %v2358_v61 = vpop.eup %2357  ;;  %v1399_v62 = vmul.f32 1.442695, %v1384_v58  ;;  %v1605_v58 = vld [vmem:[#allocation11 + $0x10] sm:$0xff] }
 0x789   :  { %v2360_v63 = vpop.eup %2359  ;;  %v1397_v0 = vmul.f32 1.442695, %v1383_v60  ;;  %v1404_v1 = vsel %vm577_vm12, %v2358_v61, 0.0 }
 0x78a   :  { %2369 = vpow2.f32 %v1399_v62  ;;  %1405 = vadd.xlane.f32.xlu1 %v1404_v1  ;;  %v1401_v2 = vsel %vm577_vm12, %v2360_v63, 0.0  ;;  %v2291_v62 = vpack.c.bf16 %v1606_v59, %v1605_v58 }
 0x78b   :  { %2371 = vpow2.f32 %v1397_v0  ;;  %1402 = vadd.xlane.f32.xlu0 %v1401_v2  ;;  %v1608_v0 = vld [vmem:[#allocation11 + $0x28] sm:$0xff]  ;;  %v1610_v2 = vld [vmem:[#allocation11 + $0x38] sm:$0xff] }
 0x78c   :  { %v2362_v3 = vpop.eup %2361 }
 0x78d   :  { %v2364_v4 = vpop.eup %2363  ;;  %v1410_v6 = vsel %vm577_vm12, %v2362_v3, 0.0 }
 0x78e   :  { %1411 = vadd.xlane.f32.xlu1 %v1410_v6  ;;  %v1407_v7 = vsel %vm577_vm12, %v2364_v4, 0.0 }
 0x78f   :  { %1408 = vadd.xlane.f32.xlu0 %v1407_v7  ;;  %v1613_v7 = vld [vmem:[#allocation11 + $0x50] sm:$0xff] }
 0x790   :  { %v2366_v8 = vpop.eup %2365 }
 0x791   :  { %v2368_v9 = vpop.eup %2367  ;;  %v1416_v10 = vsel %vm577_vm12, %v2366_v8, 0.0 }
 0x792   :  { %1417 = vadd.xlane.f32.xlu1 %v1416_v10  ;;  %v1413_v11 = vsel %vm577_vm12, %v2368_v9, 0.0  ;;  %v1615_v10 = vld [vmem:[#allocation11 + $0x60] sm:$0xf] }
 0x793   :  { %1414 = vadd.xlane.f32.xlu0 %v1413_v11 }
 0x794   :  { %v2370_v12 = vpop.eup %2369 }
 0x795   :  { %v2372_v22 = vpop.eup %2371  ;;  %v1422_v41 = vsel %vm577_vm12, %v2370_v12, 0.0 }
 0x796   :  { %1423 = vadd.xlane.f32.xlu1 %v1422_v41  ;;  %v1419_v51 = vsel %vm577_vm12, %v2372_v22, 0.0 }
 0x797   :  { %1420 = vadd.xlane.f32.xlu0 %v1419_v51  ;;  %v1819_v51 = vld [vmem:[%s3009_s12] ss:$0 sm:$0xff] }
 0x817   :  { %v1406_v13 = vpop.xlane.xlu1 %1405 }
 0x818   :  { %2373 = vrcp.f32 %v1406_v13  ;;  %v1403_v14 = vpop.xlane.xlu0 %1402 }
 0x819   :  { %2375 = vrcp.f32 %v1403_v14 }
 0x81b   :  { %v1412_v53 = vpop.xlane.xlu1 %1411 }
 0x81c   :  { %2377 = vrcp.f32 %v1412_v53  ;;  %v1409_v15 = vpop.xlane.xlu0 %1408 }
 0x81d   :  { %2379 = vrcp.f32 %v1409_v15 }
 0x81f   :  { %v1418_v16 = vpop.xlane.xlu1 %1417 }
 0x820   :  { %2381 = vrcp.f32 %v1418_v16  ;;  %v1415_v17 = vpop.xlane.xlu0 %1414 }
 0x821   :  { %2383 = vrcp.f32 %v1415_v17 }
 0x822   :  { %v2374_v18 = vpop.eup %2373 }
 0x823   :  { %v2376_v57 = vpop.eup %2375  ;;  %v1434_v19 = vmul.f32 %v2374_v18, %v2358_v61  ;;  %v1424_v20 = vpop.xlane.xlu1 %1423 }
 0x824   :  { %v1433_v21 = vmul.f32 %v2376_v57, %v2360_v63  ;;  %2385 = vrcp.f32 %v1424_v20  ;;  %v1421_v23 = vpop.xlane.xlu0 %1420  ;;  %v1607_v63 = vld [vmem:[#allocation11 + $0x20] sm:$0xff] }
 0x825   :  { %2387 = vrcp.f32 %v1421_v23  ;;  %v1442_v25 = vsel %vm577_vm12, %v1434_v19, 0.0  ;;  %v2295_v1 = vpack.c.bf16 %v1608_v0, %v1607_v63 }
 0x826   :  { %v2378_v24 = vpop.eup %2377  ;;  %v1441_v26 = vsel %vm577_vm12, %v1433_v21, 0.0  ;;  %v2567_v21 = vmov 0  }
 0x827   :  { %v2380_v27 = vpop.eup %2379  ;;  %v1436_v28 = vmul.f32 %v2378_v24, %v2362_v3  ;;  %v1443_v30 = vadd.f32 %v1442_v25, %v1441_v26  ;;  %v1611_v3 = vld [vmem:[#allocation11 + $0x40] sm:$0xff]  ;;  %2323 = vset.pattern.permute.xlu0 %v2567_v21  ;;  %2324 = vset.pattern.permute.xlu1 %v2567_v21 }
 0x828   :  { %v1435_v29 = vmul.f32 %v2380_v27, %v2364_v4  ;;  %v1612_v4 = vld [vmem:[#allocation11 + $0x48] sm:$0xff] }
 0x829   :  { %v1446_v36 = vsel %vm577_vm12, %v1436_v28, 0.0  ;;  %v2303_v6 = vpack.c.bf16 %v1612_v4, %v1611_v3 }
 0x82a   :  { %v2382_v31 = vpop.eup %2381  ;;  %v1444_v32 = vsel %vm577_vm12, %v1435_v29, 0.0 }
 0x82b   :  { %v2384_v33 = vpop.eup %2383  ;;  %v1445_v34 = vadd.f32 %v1444_v32, %v1443_v30  ;;  %v1438_v35 = vmul.f32 %v2382_v31, %v2366_v8  ;;  %v1614_v8 = vld [vmem:[#allocation11 + $0x58] sm:$0xff] }
 0x82c   :  { %v1437_v37 = vmul.f32 %v2384_v33, %v2368_v9  ;;  %v2307_v9 = vpack.c.bf16 %v1614_v8, %v1613_v7 }
 0x82d   :  { %v1447_v42 = vadd.f32 %v1446_v36, %v1445_v34  ;;  %v1449_v44 = vsel %vm577_vm12, %v1438_v35, 0.0  ;;  %v1730_v35 = vld [vmem:[%s3010_s13] sm:$0xff] }
 0x82e   :  { %v2386_v43 = vpop.eup %2385  ;;  %v1448_v45 = vsel %vm577_vm12, %v1437_v37, 0.0 }
 0x82f   :  { %v2388_v46 = vpop.eup %2387  ;;  %v1455_v47 = vmul.f32 0.25, %v1447_v42  ;;  %v1440_v49 = vmul.f32 %v2386_v43, %v2370_v12  ;;  %v1450_v52 = vadd.f32 %v1449_v44, %v1448_v45 }
 0x830   :  { %v1439_v50 = vmul.f32 %v2388_v46, %v2372_v22 }
 0x831   :  { %2131 = vmatmul.mubr.msk.f32.vlgmr.msra.gmra.mrb[12].mxu1 %vm577_vm12, %v1455_v47  ;;  %v1453_v56 = vsel %vm577_vm12, %v1440_v49, 0.0 }
 0x832   :  { %v1451_v54 = vsel %vm577_vm12, %v1439_v50, 0.0  ;;  %2134 = vmatpush3.msra.mxu1 %v2882_v39  ;;  %2135 = vmatprep.mubr.msk.f32.mxu1 %vm2566_vm13, %v2565_v5  ;;  %v1609_v39 = vld [vmem:[#allocation11 + $0x30] sm:$0xff] }
 0x833   :  { %v1452_v55 = vadd.f32 %v1451_v54, %v1450_v52  ;;  %2288 = vmatprep.subr.bf16.mxu1 %v2287_v48  ;;  %v2299_v5 = vpack.c.bf16 %v1610_v2, %v1609_v39  ;;  %v2391_v52 = vld [vmem:[%s2997_s0] sm:$0xff] }
 0x835   :  { %v1454_v60 = vadd.f32 %v1453_v56, %v1452_v55  ;;  %v2392_v55 = vld [vmem:[%s2997_s0 + $0x8] sm:$0xff] }
 0x837   :  { %v1456_v61 = vmul.f32 0.25, %v1454_v60 }
 0x839   :  { %2136 = vmatmul.mubr.msk.f32.vlgmr.msra.gmra.mrb[14].mxu1 %vm577_vm12, %v1456_v61 }
 0x83a   :  { %2290 = vmatpush3.bf16.msra.mxu1 %v2287_v48 }
 0x83b   :  { %2292 = vmatprep.subr.bf16.mxu1 %v2291_v62 }
 0x83e   :  { %2294 = vmatpush3.bf16.msra.mxu1 %v2291_v62 }
 0x83f   :  { %2296 = vmatprep.subr.bf16.mxu1 %v2295_v1 }
 0x842   :  { %2298 = vmatpush3.bf16.msra.mxu1 %v2295_v1 }
 0x843   :  { %2300 = vmatprep.subr.bf16.mxu1 %v2299_v5 }
 0x846   :  { %2302 = vmatpush3.bf16.msra.mxu1 %v2299_v5 }
 0x847   :  { %2304 = vmatprep.subr.bf16.mxu1 %v2303_v6 }
 0x84a   :  { %2306 = vmatpush3.bf16.msra.mxu1 %v2303_v6 }
 0x84b   :  { %2308 = vmatprep.subr.bf16.mxu1 %v2307_v9 }
 0x84e   :  { %2310 = vmatpush3.bf16.msra.mxu1 %v2307_v9 }
 0x84f   :  { %2162 = vmatprep.subr.msk.mxu1 %vm162_vm1, %v1615_v10 }
 0x852   :  { %2163 = vmatpush3.msk.msra.mxu1 %vm162_vm1, %v1615_v10 }
 0x904   :  { %v1526_v11 = vpop.f32.mrb[12].mxu1 }
 0x905   :  { %v2132_v12 = vpop.f32.mrb[13].mxu1  ;;  %2164 = vmatprep.mubr.msk.f32.mxu1 %vm155_vm0, %v1526_v11 }
 0x90c   :  { %v1599_v22 = vpop.f32.mrb[14].mxu1 }
 0x90d   :  { %v2137_v41 = vpop.f32.mrb[15].mxu1  ;;  %2165 = vmatmul.mubr.msk.f32.vlgmr.msra.gmra.mrb[16].mxu1 %vm155_vm0, %v1599_v22 }
 0x9e0   :  { %v2166_v13 = vpop.f32.mrb[16].mxu1 }
 0x9e1   :  { %v1704_v14 = vadd.f32 %v2166_v13, %v1819_v51  ;;  %v1698_v53 = vpop.f32.mrb[17].mxu1 }
 0x9e2   :  { %v1699_v15 = vadd.f32 %v1819_v51, %v1698_v53 }
 0x9e3   :  { %v1710_v16 = vsel %vm155_vm0, %v1704_v14, 0.0  ;;  %v1715_v17 = vmul.f32 %v1704_v14, %v1704_v14 }
 0x9e4   :  { %1711 = vadd.xlane.f32.xlu1 %v1710_v16  ;;  %v1707_v18 = vsel %vm155_vm0, %v1699_v15, 0.0  ;;  %v1714_v57 = vmul.f32 %v1699_v15, %v1699_v15 }
 0x9e5   :  { %1708 = vadd.xlane.f32.xlu0 %v1707_v18  ;;  %v1719_v19 = vsel %vm155_vm0, %v1715_v17, 0.0 }
 0x9e6   :  { %v1716_v20 = vsel %vm155_vm0, %v1714_v57, 0.0 }
 0x9e8   :  { %1720 = vadd.xlane.f32.xlu1 %v1719_v19 }
 0x9e9   :  { %1717 = vadd.xlane.f32.xlu0 %v1716_v20 }
 0xa71   :  { %v1712_v23 = vpop.xlane.xlu1 %1711 }
 0xa72   :  { %v1709_v24 = vpop.xlane.xlu0 %1708 }
 0xa73   :  { %v1713_v25 = vadd.f32 %v1712_v23, %v1709_v24 }
 0xa75   :  { %v1723_v26 = vmul.f32 0.005, %v1713_v25  ;;  %v1721_v27 = vpop.xlane.xlu1 %1720 }
 0xa76   :  { %v1718_v28 = vpop.xlane.xlu0 %1717 }
 0xa77   :  { %v1722_v29 = vadd.f32 %v1721_v27, %v1718_v28  ;;  %v1725_v30 = vmul.f32 %v1723_v26, %v1723_v26 }
 0xa79   :  { %v1724_v31 = vmul.f32 0.005, %v1722_v29 }
 0xa7b   :  { %v1726_v32 = vsub.f32 %v1724_v31, %v1725_v30 }
 0xa7d   :  { %v1727_v33 = vmax.f32 %v1726_v32, 0.0 }
 0xa7f   :  { %v1728_v34 = vadd.f32 1e-05, %v1727_v33 }
 0xa81   :  { %2389 = vrsqrt.f32 %v1728_v34 }
 0xa8b   :  { %v2390_v36 = vpop.eup %2389 }
 0xa8c   :  { %v1731_v37 = vmul.f32 %v2390_v36, %v1730_v35 }
 0xa8e   :  { %1737 = vperm.xlu0 %2323, %v1731_v37   ;;  %v1733_v40 = vmul.f32 %v1731_v37, %v1723_v26 }
 0xa90   :  { %v1734_v42 = vsub.f32 %v1732_v38, %v1733_v40 }
 0xa92   :  { %1744 = vperm.xlu1 %2324, %v1734_v42  }
 0xb0d   :  { %v1738_v43 = vpop.permute.xlu0 %1737 }
 0xb0e   :  { %v1740_v44 = vmul.f32 %v1738_v43, %v1699_v15  ;;  %v1741_v45 = vmul.f32 %v1738_v43, %v1704_v14 }
 0xb11   :  { %v1745_v46 = vpop.permute.xlu1 %1744 }
 0xb12   :  { %v1747_v47 = vadd.f32 %v1745_v46, %v1740_v44  ;;  %v1748_v48 = vadd.f32 %v1745_v46, %v1741_v45 }
 0xb14   :  { %v1749_v49 = vmax.f32 %v1747_v47, 0.0  ;;  %v1750_v50 = vmax.f32 %v1748_v48, 0.0 }
 0xb16   :  { %v1751_v54 = vadd.f32 %v2391_v52, %v1749_v49  ;;  %v1752_v56 = vadd.f32 %v2392_v55, %v1750_v50 }
 0xb18   :  { %1753 = vst.msk [vmem:[#allocation13] sm:$0xff] %vm155_vm0, %v1751_v54  ;;  %1754 = vst.msk [vmem:[#allocation13 + $0x8] sm:$0xff] %vm155_vm0, %v1752_v56 }
 0xb19   :  { %2536 = shalt.err (!%p2533_p10)
}
 0xb1a   :  { %s2537_s18 = scalar_lea.hbm %s3012_s15, 256 }
 0xb1b   :  { %p2538_p11 = scmp.ne.s32.totalorder %s3012_s15, %s2537_s18  ;;  %p2541_p12 = scmp.lt.u32.totalorder %s2537_s18, %s3012_s15 }
 0xb1d   :  { %p2543_p13 = pnand %p2541_p12, %p2538_p11 }
 0xb1f   :  { %2546 = shalt.err (!%p2543_p13)
}
 0xb20   :  { %1766 = dma.vmem_to_hbm [thread:$0]  %s1761_s19, 256, %s3012_s15, [#allocation4], %s2559_s30, %s2559_s30, %s2560_s16  }
 0xb21   :  { %2555 = dma.done.wait [#allocation4], 256  }
 0xb22   :  { %2556 = vsyncadd [#allocation4], 4294967040 }
 0xb23   :  { %1770 = vsyncpa [#allocation3], 1 }
 0xb24   :  { %1771 = vsyncpa [#allocation6], 1 }
 0xb25   :  { %1772 = vsyncpa [#allocation9], 1 }
 0xb26   :  { %1773 = vsyncpa [#allocation12], 1 }
 0xb27   :  { %1774 = vsyncpa [#allocation4], 1 }

</bundles_post_ra>
